<compile_context>
chip_gen: v7x
topology: tpu7x:2x2x1
jax: 0.10.0
libtpu: 0.0.40
codegen_flags: <defaults>
</compile_context>

<pallas_src>
import functools

import jax
import jax.numpy as jnp
from jax.experimental import pallas as pl
from jax.experimental.pallas import tpu as pltpu

INPUT_DIM = 256
HIDDEN_DIM = 512
NUM_DOMAINS = 2
OUT_PAD = 128  # lane-dense padded width of the final projection


def domain_classifier_kernel(x_ref, w1_ref, b1_ref, w2_ref, b2_ref,
                             w3_ref, b3_ref, o_ref, acc_ref,
                             *, hw_total, hw_blk, needs_mask):
    """Grid = (n_blocks [parallel], hw_blocks [arbitrary reduction])."""
    j = pl.program_id(1)

    # Zero the pooled-sum accumulator at the start of each reduction sweep.
    @pl.when(j == 0)
    def _init():
        acc_ref[...] = jnp.zeros_like(acc_ref)

    # x tile: (N_BLK, C, HW_BLK).  Sum over HW (cross-lane reduce, XLU slot).
    x = x_ref[...].astype(jnp.float32)
    if needs_mask:
        # Trailing partial HW block: zero out-of-bounds columns so the sum is exact.
        col = jax.lax.broadcasted_iota(jnp.int32, (1, 1, hw_blk), 2)
        x = jnp.where(j * hw_blk + col < hw_total, x, 0.0)
    acc_ref[...] += jnp.sum(x, axis=-1)                       # (N_BLK, C)

    # At the last reduction step: scale once by 1/HW and run the MLP.
    @pl.when(j == pl.num_programs(1) - 1)
    def _mlp():
        pooled = acc_ref[...] * (1.0 / hw_total)              # (N_BLK, C)

        # Linear(input_dim -> hidden) + ReLU   (Dropout = identity in eval)
        h1 = jnp.dot(pooled, w1_ref[...],
                     preferred_element_type=jnp.float32) + b1_ref[...]
        h1 = jnp.maximum(h1, 0.0)

        # Linear(hidden -> hidden // 2) + ReLU
        h2 = jnp.dot(h1, w2_ref[...],
                     preferred_element_type=jnp.float32) + b2_ref[...]
        h2 = jnp.maximum(h2, 0.0)

        # Linear(hidden // 2 -> num_domains), lane-padded to OUT_PAD columns.
        logits = jnp.dot(h2, w3_ref[...],
                         preferred_element_type=jnp.float32) + b3_ref[...]
        o_ref[...] = logits.astype(o_ref.dtype)               # (N_BLK, OUT_PAD)


def domain_classifier_forward(x, params):
    """x: (N, C, H, W) (or already-pooled (N, C)).  Returns (N, num_domains)."""
    w1, b1, w2, b2, w3, b3 = params

    if x.ndim == 4:
        N, C, H, W = x.shape
        hw = H * W
        x3 = x.reshape(N, C, hw)          # free reshape — no HBM transpose
    else:
        N, C = x.shape
        hw = 1
        x3 = x.reshape(N, C, 1)

    hid = w1.shape[1]
    hid2 = w2.shape[1]
    nd = w3.shape[1]
    assert C == w1.shape[0]

    b1 = jnp.reshape(b1, (1, hid))
    b2 = jnp.reshape(b2, (1, hid2))

    # Pad the final projection to a lane-dense width (unmasked stores, full MXU).
    w3p = jnp.zeros((hid2, OUT_PAD), w3.dtype).at[:, :nd].set(w3)
    b3p = jnp.zeros((1, OUT_PAD), w3.dtype).at[:, :nd].set(jnp.reshape(b3, (1, nd)))

    # --- tiling choices -------------------------------------------------------
    n_blk = N if N <= 8 else 8
    if hw % 128 == 0:
        hw_blk = min(hw, 512)             # lane-aligned tile, modest VMEM footprint
    else:
        hw_blk = hw if hw <= 1024 else 512
    needs_mask = (hw % hw_blk) != 0
    grid = (pl.cdiv(N, n_blk), pl.cdiv(hw, hw_blk))

    kernel = functools.partial(domain_classifier_kernel,
                               hw_total=hw, hw_blk=hw_blk, needs_mask=needs_mask)

    # Advisory cost estimate: HBM-bound on streaming x.
    weight_bytes = (C * hid + hid + hid * hid2 + hid2 + hid2 * OUT_PAD + OUT_PAD) * 4
    cost = pl.CostEstimate(
        flops=int(2 * N * (C * hid + hid * hid2 + hid2 * OUT_PAD) + 2 * N * hw * C),
        transcendentals=0,
        bytes_accessed=int(x3.size * x3.dtype.itemsize + weight_bytes
                           + N * OUT_PAD * 4),
    )

    out = pl.pallas_call(
        kernel,
        out_shape=jax.ShapeDtypeStruct((N, OUT_PAD), jnp.float32),
        grid_spec=pltpu.PrefetchScalarGridSpec(
            num_scalar_prefetch=0,
            grid=grid,
            in_specs=[
                # activation: tiled over batch blocks and HW blocks
                pl.BlockSpec((n_blk, C, hw_blk), lambda i, j: (i, 0, j)),
                # weights / biases: constant index map -> resident, DMA'd once
                pl.BlockSpec((C, hid), lambda i, j: (0, 0)),
                pl.BlockSpec((1, hid), lambda i, j: (0, 0)),
                pl.BlockSpec((hid, hid2), lambda i, j: (0, 0)),
                pl.BlockSpec((1, hid2), lambda i, j: (0, 0)),
                pl.BlockSpec((hid2, OUT_PAD), lambda i, j: (0, 0)),
                pl.BlockSpec((1, OUT_PAD), lambda i, j: (0, 0)),
            ],
            # Same output block across the reduction axis -> stays resident in VMEM.
            out_specs=pl.BlockSpec((n_blk, OUT_PAD), lambda i, j: (i, 0)),
            scratch_shapes=[pltpu.VMEM((n_blk, C), jnp.float32)],
        ),
        compiler_params=pltpu.CompilerParams(
            dimension_semantics=("parallel", "arbitrary"),
            vmem_limit_bytes=32 << 20,
        ),
        cost_estimate=cost,
    )(x3, w1, b1, w2, b2, w3p, b3p)

    return out[:, :nd]


def init_params(key):
    """Deterministic init.  Weights stored as (in, out) (i.e. torch W.T)."""
    k1, k2, k3 = jax.random.split(key, 3)
    hid2 = HIDDEN_DIM // 2
    w1 = jax.random.normal(k1, (INPUT_DIM, HIDDEN_DIM), jnp.float32) * 0.02
    b1 = jnp.zeros((1, HIDDEN_DIM), jnp.float32)
    w2 = jax.random.normal(k2, (HIDDEN_DIM, hid2), jnp.float32) * 0.02
    b2 = jnp.full((1, hid2), 0.01, jnp.float32)
    w3 = jax.random.normal(k3, (hid2, NUM_DOMAINS), jnp.float32) * 0.02
    b3 = jnp.full((1, NUM_DOMAINS), 0.01, jnp.float32)
    return (w1, b1, w2, b2, w3, b3)


def reference_forward(x_nchw, params):
    """Plain-JAX reference mirroring the PyTorch module (eval mode)."""
    w1, b1, w2, b2, w3, b3 = params
    N = x_nchw.shape[0]
    pooled = jnp.mean(x_nchw.astype(jnp.float32), axis=(2, 3)).reshape(N, -1)
    h1 = jnp.maximum(pooled @ w1 + b1, 0.0)
    h2 = jnp.maximum(h1 @ w2 + b2, 0.0)
    return h2 @ w3 + b3


if __name__ == "__main__":
    key = jax.random.PRNGKey(0)
    k_x, k_p = jax.random.split(key)

    # Small, module-consistent shapes: batch=2, channels=input_dim=256, spatial=8x8.
    N, H, W = 2, 8, 8
    x = jax.random.normal(k_x, (N, INPUT_DIM, H, W), jnp.float32)
    params = init_params(k_p)

    # f32 path — must match the reference tightly.
    out = domain_classifier_forward(x, params)
    out = jax.block_until_ready(out)
    ref = reference_forward(x, params)
    assert out.shape == (N, NUM_DOMAINS)
    assert jnp.allclose(out, ref, atol=1e-4, rtol=1e-4), "mismatch vs reference (f32)"

    # bf16 activation streaming (halves HBM bytes on the dominant term);
    # pooling / matmuls still accumulate in f32 inside the kernel.
    out_bf16 = domain_classifier_forward(x.astype(jnp.bfloat16), params)
    out_bf16 = jax.block_until_ready(out_bf16)
    assert jnp.allclose(out_bf16, ref, atol=5e-2, rtol=5e-2), "mismatch vs reference (bf16)"

    print("KERNEL_OK")
</pallas_src>

<mosaic_0001>
module attributes {stable_mosaic.version = 11 : i64} {
  func.func @domain_classifier_kernel(%arg0: i32, %arg1: i32, %arg2: memref<2x256x64xf32, #tpu.memory_space<vmem>>, %arg3: memref<256x512xf32, #tpu.memory_space<vmem>>, %arg4: memref<1x512xf32, #tpu.memory_space<vmem>>, %arg5: memref<512x256xf32, #tpu.memory_space<vmem>>, %arg6: memref<1x256xf32, #tpu.memory_space<vmem>>, %arg7: memref<256x128xf32, #tpu.memory_space<vmem>>, %arg8: memref<1x128xf32, #tpu.memory_space<vmem>>, %arg9: memref<2x128xf32, #tpu.memory_space<vmem>>, %arg10: memref<2x256xf32, #tpu.memory_space<vmem>>) attributes {dimension_semantics = [#tpu.dimension_semantics<parallel>, #tpu.dimension_semantics<arbitrary>], iteration_bounds = array<i64: 1, 1>, scalar_prefetch = 0 : i64, scratch_operands = 1 : i64, tpu.core_type = #tpu.core_type<tc>, window_params = [{transform_indices = @transform_0, window_bounds = array<i64: 2, 256, 64>}, {pipeline_mode = #tpu.pipeline_mode<synchronous>, transform_indices = @transform_1, window_bounds = array<i64: 256, 512>}, {pipeline_mode = #tpu.pipeline_mode<synchronous>, transform_indices = @transform_2, window_bounds = array<i64: 1, 512>}, {pipeline_mode = #tpu.pipeline_mode<synchronous>, transform_indices = @transform_3, window_bounds = array<i64: 512, 256>}, {pipeline_mode = #tpu.pipeline_mode<synchronous>, transform_indices = @transform_4, window_bounds = array<i64: 1, 256>}, {pipeline_mode = #tpu.pipeline_mode<synchronous>, transform_indices = @transform_5, window_bounds = array<i64: 256, 128>}, {pipeline_mode = #tpu.pipeline_mode<synchronous>, transform_indices = @transform_6, window_bounds = array<i64: 1, 128>}, {transform_indices = @transform_7, window_bounds = array<i64: 2, 128>}]} {
    %c0_i32 = arith.constant 0 : i32
    %0 = arith.cmpi eq, %arg1, %c0_i32 : i32
    %1 = arith.extui %0 : i1 to i32
    %c0_i32_0 = arith.constant 0 : i32
    %2 = arith.cmpi ne, %1, %c0_i32_0 : i32
    scf.if %2 {
      %cst_9 = arith.constant 0.000000e+00 : f32
      %11 = vector.broadcast %cst_9 : f32 to vector<2x256xf32>
      %c0_10 = arith.constant 0 : index
      %c0_11 = arith.constant 0 : index
      %12 = vector.load %arg10[%c0_10, %c0_11] : memref<2x256xf32, #tpu.memory_space<vmem>>, vector<2x256xf32>
      tpu.vector_store %arg10[%c0_10, %c0_11], %11 {strides = array<i32>} : memref<2x256xf32, #tpu.memory_space<vmem>>, vector<2x256xf32>,
    } else {
    }
    %c0 = arith.constant 0 : index
    %c0_1 = arith.constant 0 : index
    %c0_2 = arith.constant 0 : index
    %3 = vector.load %arg2[%c0, %c0_1, %c0_2] : memref<2x256x64xf32, #tpu.memory_space<vmem>>, vector<2x256x64xf32>
    %c0_3 = arith.constant 0 : index
    %c0_4 = arith.constant 0 : index
    %4 = vector.load %arg10[%c0_3, %c0_4] : memref<2x256xf32, #tpu.memory_space<vmem>>, vector<2x256xf32>
    %cst = arith.constant dense<0.000000e+00> : vector<2x256xf32>
    %5 = vector.multi_reduction <add>, %3, %cst [2] : vector<2x256x64xf32> to vector<2x256xf32>
    %6 = arith.addf %4, %5 : vector<2x256xf32>
    %c0_5 = arith.constant 0 : index
    %c0_6 = arith.constant 0 : index
    %7 = vector.load %arg10[%c0_5, %c0_6] : memref<2x256xf32, #tpu.memory_space<vmem>>, vector<2x256xf32>
    tpu.vector_store %arg10[%c0_5, %c0_6], %6 {strides = array<i32>} : memref<2x256xf32, #tpu.memory_space<vmem>>, vector<2x256xf32>,
    %c0_i32_7 = arith.constant 0 : i32
    %8 = arith.cmpi eq, %arg1, %c0_i32_7 : i32
    %9 = arith.extui %8 : i1 to i32
    %c0_i32_8 = arith.constant 0 : i32
    %10 = arith.cmpi ne, %9, %c0_i32_8 : i32
    scf.if %10 {
      %c0_9 = arith.constant 0 : index
      %c0_10 = arith.constant 0 : index
      %11 = vector.load %arg10[%c0_9, %c0_10] : memref<2x256xf32, #tpu.memory_space<vmem>>, vector<2x256xf32>
      %cst_11 = arith.constant 1.562500e-02 : f32
      %12 = vector.broadcast %cst_11 : f32 to vector<2x256xf32>
      %13 = arith.mulf %11, %12 : vector<2x256xf32>
      %c0_12 = arith.constant 0 : index
      %c0_13 = arith.constant 0 : index
      %14 = vector.load %arg3[%c0_12, %c0_13] : memref<256x512xf32, #tpu.memory_space<vmem>>, vector<256x512xf32>
      %cst_14 = arith.constant dense<0.000000e+00> : vector<2x512xf32>
      %15 = tpu.matmul %13, %14, %cst_14 {dimension_numbers = #tpu.dot_dimension_numbers<[1], [0], [0], [1], [0, 0, 1, 1], [], []>} : vector<2x256xf32>, vector<256x512xf32>, vector<2x512xf32> -> vector<2x512xf32>
      %c0_15 = arith.constant 0 : index
      %c0_16 = arith.constant 0 : index
      %16 = vector.load %arg4[%c0_15, %c0_16] : memref<1x512xf32, #tpu.memory_space<vmem>>, vector<1x512xf32>
      %17 = vector.broadcast %16 : vector<1x512xf32> to vector<2x512xf32>
      %18 = arith.addf %15, %17 : vector<2x512xf32>
      %cst_17 = arith.constant 0.000000e+00 : f32
      %19 = vector.broadcast %cst_17 : f32 to vector<2x512xf32>
      %20 = arith.maximumf %18, %19 : vector<2x512xf32>
      %c0_18 = arith.constant 0 : index
      %c0_19 = arith.constant 0 : index
      %21 = vector.load %arg5[%c0_18, %c0_19] : memref<512x256xf32, #tpu.memory_space<vmem>>, vector<512x256xf32>
      %cst_20 = arith.constant dense<0.000000e+00> : vector<2x256xf32>
      %22 = tpu.matmul %20, %21, %cst_20 {dimension_numbers = #tpu.dot_dimension_numbers<[1], [0], [0], [1], [0, 0, 1, 1], [], []>} : vector<2x512xf32>, vector<512x256xf32>, vector<2x256xf32> -> vector<2x256xf32>
      %c0_21 = arith.constant 0 : index
      %c0_22 = arith.constant 0 : index
      %23 = vector.load %arg6[%c0_21, %c0_22] : memref<1x256xf32, #tpu.memory_space<vmem>>, vector<1x256xf32>
      %24 = vector.broadcast %23 : vector<1x256xf32> to vector<2x256xf32>
      %25 = arith.addf %22, %24 : vector<2x256xf32>
      %cst_23 = arith.constant 0.000000e+00 : f32
      %26 = vector.broadcast %cst_23 : f32 to vector<2x256xf32>
      %27 = arith.maximumf %25, %26 : vector<2x256xf32>
      %c0_24 = arith.constant 0 : index
      %c0_25 = arith.constant 0 : index
      %28 = vector.load %arg7[%c0_24, %c0_25] : memref<256x128xf32, #tpu.memory_space<vmem>>, vector<256x128xf32>
      %cst_26 = arith.constant dense<0.000000e+00> : vector<2x128xf32>
      %29 = tpu.matmul %27, %28, %cst_26 {dimension_numbers = #tpu.dot_dimension_numbers<[1], [0], [0], [1], [0, 0, 1, 1], [], []>} : vector<2x256xf32>, vector<256x128xf32>, vector<2x128xf32> -> vector<2x128xf32>
      %c0_27 = arith.constant 0 : index
      %c0_28 = arith.constant 0 : index
      %30 = vector.load %arg8[%c0_27, %c0_28] : memref<1x128xf32, #tpu.memory_space<vmem>>, vector<1x128xf32>
      %31 = vector.broadcast %30 : vector<1x128xf32> to vector<2x128xf32>
      %32 = arith.addf %29, %31 : vector<2x128xf32>
      %c0_29 = arith.constant 0 : index
      %c0_30 = arith.constant 0 : index
      %33 = vector.load %arg9[%c0_29, %c0_30] : memref<2x128xf32, #tpu.memory_space<vmem>>, vector<2x128xf32>
      tpu.vector_store %arg9[%c0_29, %c0_30], %32 {strides = array<i32>} : memref<2x128xf32, #tpu.memory_space<vmem>>, vector<2x128xf32>,
    } else {
    }
    return
  }
  func.func @transform_0(%arg0: i32, %arg1: i32) -> (i32, i32, i32) {
    %c0_i32 = arith.constant 0 : i32
    %c0_i32_0 = arith.constant 0 : i32
    return %arg0, %c0_i32, %arg1 : i32, i32, i32
  }
  func.func @transform_1(%arg0: i32, %arg1: i32) -> (i32, i32) {
    %c0_i32 = arith.constant 0 : i32
    %c0_i32_0 = arith.constant 0 : i32
    %c0_i32_1 = arith.constant 0 : i32
    return %c0_i32, %c0_i32_0 : i32, i32
  }
  func.func @transform_2(%arg0: i32, %arg1: i32) -> (i32, i32) {
    %c0_i32 = arith.constant 0 : i32
    %c0_i32_0 = arith.constant 0 : i32
    %c0_i32_1 = arith.constant 0 : i32
    return %c0_i32, %c0_i32_0 : i32, i32
  }
  func.func @transform_3(%arg0: i32, %arg1: i32) -> (i32, i32) {
    %c0_i32 = arith.constant 0 : i32
    %c0_i32_0 = arith.constant 0 : i32
    %c0_i32_1 = arith.constant 0 : i32
    return %c0_i32, %c0_i32_0 : i32, i32
  }
  func.func @transform_4(%arg0: i32, %arg1: i32) -> (i32, i32) {
    %c0_i32 = arith.constant 0 : i32
    %c0_i32_0 = arith.constant 0 : i32
    %c0_i32_1 = arith.constant 0 : i32
    return %c0_i32, %c0_i32_0 : i32, i32
  }
  func.func @transform_5(%arg0: i32, %arg1: i32) -> (i32, i32) {
    %c0_i32 = arith.constant 0 : i32
    %c0_i32_0 = arith.constant 0 : i32
    %c0_i32_1 = arith.constant 0 : i32
    return %c0_i32, %c0_i32_0 : i32, i32
  }
  func.func @transform_6(%arg0: i32, %arg1: i32) -> (i32, i32) {
    %c0_i32 = arith.constant 0 : i32
    %c0_i32_0 = arith.constant 0 : i32
    %c0_i32_1 = arith.constant 0 : i32
    return %c0_i32, %c0_i32_0 : i32, i32
  }
  func.func @transform_7(%arg0: i32, %arg1: i32) -> (i32, i32) {
    %c0_i32 = arith.constant 0 : i32
    %c0_i32_0 = arith.constant 0 : i32
    return %arg0, %c0_i32 : i32, i32
  }
}

</mosaic_0001>

<bundles_post_ra>
// kernel: tpu_custom_call.1
= control target key start
LH: loop header
LB: loop body
LE: loop exit
PB: predicated region body
PF: predicated region fallthrough
CT: control target
= control target key end

     0   :  { %12 = vsyncpa [#allocation4], 0  ;;  %s6458_s0 = inlined_call_operand.vmem [shape: f32[2,256,64], index: 0, kind: input, shape index: {}]   ;;  %s6459_s1 = inlined_call_operand.hbm [shape: f32[256,512], index: 1, kind: input, shape index: {}]   ;;  %s6460_s2 = inlined_call_operand.vmem [shape: f32[1,512], index: 2, kind: input, shape index: {}]   ;;  %s6461_s3 = inlined_call_operand.hbm [shape: f32[512,256], index: 3, kind: input, shape index: {}]   ;;  %s6462_s4 = inlined_call_operand.vmem [shape: f32[1,256], index: 4, kind: input, shape index: {}]   ;;  %s6463_s5 = inlined_call_operand.vmem [shape: f32[256,128], index: 5, kind: input, shape index: {}]   ;;  %s6464_s6 = inlined_call_operand.vmem [shape: f32[1,128], index: 6, kind: input, shape index: {}]   ;;  %s6465_s7 = inlined_call_operand.hbm [shape: f32[2,128], index: 7, kind: output, shape index: {}]  }
   0x1   :  { %13 = vsyncpa [#allocation7], 0 }
   0x2   :  { %14 = vsyncpa [#allocation5], 0  ;;  %s4954_s24 = smov [#allocation3]   ;;  %s4882_s28 = scalar_lea.hbm %s6459_s1, 16384 }
   0x3   :  { %s22_s25 = sshll.u32 %s4954_s24, 4  ;;  %p4883_p0 = scmp.ne.s32.totalorder %s6459_s1, %s4882_s28  ;;  %s23_s25 = int_to_ptr.vmem [resolvable:$true] %s22_s25 }
   0x4   :  { %p4886_p1 = scmp.lt.u32.totalorder %s4882_s28, %s6459_s1 }
   0x6   :  { %p4888_p2 = pnand %p4886_p1, %p4883_p0 }
   0x8   :  { %4891 = shalt.err (!%p4888_p2)
}
   0x9   :  { %s4892_s10 = scalar_lea.vmem %s23_s25, 16384  ;;  %p4897_p4 = scmp.lt.s32.totalorder %s23_s25, %s23_s25 }
   0xa   :  { %p4893_p3 = scmp.ne.s32.totalorder %s23_s25, %s4892_s10  ;;  %p4898_p5 = scmp.lt.s32.totalorder %s4892_s10, %s4892_s10 }
   0xc   :  { %p4899_p6 = por %p4898_p5, %p4897_p4 }
   0xe   :  { %p4900_p7 = pnand %p4899_p6, %p4893_p3 }
  0x10   :  { %4903 = shalt.err (!%p4900_p7)
}
  0x11   :  { %s4955_s11 = smov 512   ;;  %s4956_s12 = smov 32  }
  0x12   :  { %28 = dma.hbm_to_vmem [thread:$0]  %s6459_s1, 16384, %s23_s25, [#allocation4], %s4955_s11, %s4955_s11, %s4956_s12  }
  0x13   :  { %s4957_s15 = smov [#allocation6]   ;;  %s4904_s19 = scalar_lea.hbm %s6461_s3, 16384 }
  0x14   :  { %s36_s16 = sshll.u32 %s4957_s15, 4  ;;  %p4905_p8 = scmp.ne.s32.totalorder %s6461_s3, %s4904_s19  ;;  %s37_s16 = int_to_ptr.vmem [resolvable:$true] %s36_s16 }
  0x15   :  { %p4908_p9 = scmp.lt.u32.totalorder %s4904_s19, %s6461_s3 }
  0x17   :  { %p4910_p10 = pnand %p4908_p9, %p4905_p8 }
  0x19   :  { %4913 = shalt.err (!%p4910_p10)
}
  0x1a   :  { %s4914_s24 = scalar_lea.vmem %s37_s16, 16384  ;;  %p4919_p12 = scmp.lt.s32.totalorder %s37_s16, %s37_s16 }
  0x1b   :  { %p4915_p11 = scmp.ne.s32.totalorder %s37_s16, %s4914_s24  ;;  %p4920_p13 = scmp.lt.s32.totalorder %s4914_s24, %s4914_s24 }
  0x1d   :  { %p4921_p0 = por %p4920_p13, %p4919_p12 }
  0x1f   :  { %p4922_p1 = pnand %p4921_p0, %p4915_p11 }
  0x21   :  { %4925 = shalt.err (!%p4922_p1)
}
  0x22   :  { %s4958_s1 = smov 256   ;;  %s4959_s25 = smov 16  }
  0x23   :  { %42 = dma.hbm_to_vmem [thread:$0]  %s6461_s3, 16384, %s37_s16, [#allocation7], %s4958_s1, %s4958_s1, %s4959_s25  }
  0x24   :  { %4948 = dma.done.wait [#allocation4], 16384  }
  0x25   :  { %4949 = vsyncadd [#allocation4], 4294950912 }
  0x26   :  { %4950 = dma.done.wait [#allocation7], 16384  }
  0x27   :  { %4951 = vsyncadd [#allocation7], 4294950912  ;;  %vm125_vm0 = vcmask 523264   ;;  %v76_v0 = vld [vmem:[%s6458_s0 + $0x80] sm:$0xff]  ;;  %v77_v2 = vld [vmem:[%s6458_s0 + $0x88] sm:$0xff]  ;;  %v4960_v28 = vmov 0  }
  0x28   :  { %v60_v1 = vld [vmem:[%s6458_s0] sm:$0xff]  ;;  %v174_v3 = vsel %vm125_vm0, %v76_v0, 0.0  ;;  %v61_v5 = vld [vmem:[%s6458_s0 + $0x8] sm:$0xff]  ;;  %v177_v6 = vsel %vm125_vm0, %v77_v2, 0.0  ;;  %v78_v16 = vld [vmem:[%s6458_s0 + $0x90] sm:$0xff]  ;;  %4880 = vset.pattern.permute.xlu0 %v4960_v28  ;;  %4881 = vset.pattern.permute.xlu1 %v4960_v28  ;;  %vm3465_vm1 = vcmask 130112  }
  0x29   :  { %v126_v4 = vsel %vm125_vm0, %v60_v1, 0.0  ;;  %175 = vadd.xlane.f32.xlu1 %v174_v3  ;;  %v129_v7 = vsel %vm125_vm0, %v61_v5, 0.0  ;;  %v93_v8 = vld [vmem:[%s6458_s0 + $0x108] sm:$0xff]  ;;  %v92_v9 = vld [vmem:[%s6458_s0 + $0x100] sm:$0xff]  ;;  %v62_v17 = vld [vmem:[%s6458_s0 + $0x10] sm:$0xff]  ;;  %v180_v18 = vsel %vm125_vm0, %v78_v16, 0.0 }
  0x2a   :  { %127 = vadd.xlane.f32.xlu0 %v126_v4  ;;  %v225_v10 = vsel %vm125_vm0, %v93_v8, 0.0  ;;  %v222_v11 = vsel %vm125_vm0, %v92_v9, 0.0  ;;  %v109_v12 = vld [vmem:[%s6458_s0 + $0x188] sm:$0xff]  ;;  %v108_v13 = vld [vmem:[%s6458_s0 + $0x180] sm:$0xff]  ;;  %v132_v19 = vsel %vm125_vm0, %v62_v17, 0.0  ;;  %v110_v20 = vld [vmem:[%s6458_s0 + $0x190] sm:$0xff] }
  0x2b   :  { %v273_v14 = vsel %vm125_vm0, %v109_v12, 0.0  ;;  %v270_v15 = vsel %vm125_vm0, %v108_v13, 0.0  ;;  %v94_v21 = vld [vmem:[%s6458_s0 + $0x110] sm:$0xff]  ;;  %v276_v22 = vsel %vm125_vm0, %v110_v20, 0.0  ;;  %v79_v24 = vld [vmem:[%s6458_s0 + $0x98] sm:$0xff]  ;;  %v80_v33 = vld [vmem:[%s6458_s0 + $0xa0] sm:$0xff] }
  0x2c   :  { %v228_v23 = vsel %vm125_vm0, %v94_v21, 0.0  ;;  %v63_v25 = vld [vmem:[%s6458_s0 + $0x18] sm:$0xff]  ;;  %v183_v26 = vsel %vm125_vm0, %v79_v24, 0.0  ;;  %v64_v34 = vld [vmem:[%s6458_s0 + $0x20] sm:$0xff]  ;;  %v186_v35 = vsel %vm125_vm0, %v80_v33, 0.0  ;;  %v81_v41 = vld [vmem:[%s6458_s0 + $0xa8] sm:$0xff] }
  0x2d   :  { %178 = vadd.xlane.f32.xlu1 %v177_v6  ;;  %v135_v27 = vsel %vm125_vm0, %v63_v25, 0.0  ;;  %v111_v29 = vld [vmem:[%s6458_s0 + $0x198] sm:$0xff]  ;;  %v138_v36 = vsel %vm125_vm0, %v64_v34, 0.0  ;;  %v112_v37 = vld [vmem:[%s6458_s0 + $0x1a0] sm:$0xff]  ;;  %v65_v42 = vld [vmem:[%s6458_s0 + $0x28] sm:$0xff]  ;;  %v189_v43 = vsel %vm125_vm0, %v81_v41, 0.0 }
  0x2e   :  { %130 = vadd.xlane.f32.xlu0 %v129_v7  ;;  %v95_v30 = vld [vmem:[%s6458_s0 + $0x118] sm:$0xff]  ;;  %v279_v31 = vsel %vm125_vm0, %v111_v29, 0.0  ;;  %v96_v38 = vld [vmem:[%s6458_s0 + $0x120] sm:$0xff]  ;;  %v282_v39 = vsel %vm125_vm0, %v112_v37, 0.0  ;;  %v141_v44 = vsel %vm125_vm0, %v65_v42, 0.0  ;;  %v113_v45 = vld [vmem:[%s6458_s0 + $0x1a8] sm:$0xff] }
  0x2f   :  { %v231_v32 = vsel %vm125_vm0, %v95_v30, 0.0  ;;  %v234_v40 = vsel %vm125_vm0, %v96_v38, 0.0  ;;  %v97_v46 = vld [vmem:[%s6458_s0 + $0x128] sm:$0xff]  ;;  %v285_v47 = vsel %vm125_vm0, %v113_v45, 0.0  ;;  %v82_v49 = vld [vmem:[%s6458_s0 + $0xb0] sm:$0xff]  ;;  %v83_v57 = vld [vmem:[%s6458_s0 + $0xb8] sm:$0xff] }
  0x30   :  { %v237_v48 = vsel %vm125_vm0, %v97_v46, 0.0  ;;  %v66_v50 = vld [vmem:[%s6458_s0 + $0x30] sm:$0xff]  ;;  %v192_v51 = vsel %vm125_vm0, %v82_v49, 0.0  ;;  %v67_v58 = vld [vmem:[%s6458_s0 + $0x38] sm:$0xff]  ;;  %v195_v59 = vsel %vm125_vm0, %v83_v57, 0.0  ;;  %v84_v1 = vld [vmem:[%s6458_s0 + $0xc0] sm:$0xff] }
  0x31   :  { %226 = vadd.xlane.f32.xlu1 %v225_v10  ;;  %v144_v52 = vsel %vm125_vm0, %v66_v50, 0.0  ;;  %v114_v53 = vld [vmem:[%s6458_s0 + $0x1b0] sm:$0xff]  ;;  %v147_v60 = vsel %vm125_vm0, %v67_v58, 0.0  ;;  %v115_v61 = vld [vmem:[%s6458_s0 + $0x1b8] sm:$0xff]  ;;  %v68_v2 = vld [vmem:[%s6458_s0 + $0x40] sm:$0xff]  ;;  %v198_v3 = vsel %vm125_vm0, %v84_v1, 0.0  ;;  %v385_v1 = vlaneseq }
  0x32   :  { %223 = vadd.xlane.f32.xlu0 %v222_v11  ;;  %v98_v54 = vld [vmem:[%s6458_s0 + $0x130] sm:$0xff]  ;;  %v288_v55 = vsel %vm125_vm0, %v114_v53, 0.0  ;;  %v99_v62 = vld [vmem:[%s6458_s0 + $0x138] sm:$0xff]  ;;  %v291_v63 = vsel %vm125_vm0, %v115_v61, 0.0  ;;  %v150_v4 = vsel %vm125_vm0, %v68_v2, 0.0  ;;  %v116_v5 = vld [vmem:[%s6458_s0 + $0x1c0] sm:$0xff] }
  0x33   :  { %v240_v56 = vsel %vm125_vm0, %v98_v54, 0.0  ;;  %v243_v0 = vsel %vm125_vm0, %v99_v62, 0.0  ;;  %v100_v6 = vld [vmem:[%s6458_s0 + $0x140] sm:$0xff]  ;;  %v294_v7 = vsel %vm125_vm0, %v116_v5, 0.0  ;;  %v85_v9 = vld [vmem:[%s6458_s0 + $0xc8] sm:$0xff]  ;;  %v86_v17 = vld [vmem:[%s6458_s0 + $0xd0] sm:$0xff] }
  0x34   :  { %v246_v8 = vsel %vm125_vm0, %v100_v6, 0.0  ;;  %v69_v10 = vld [vmem:[%s6458_s0 + $0x48] sm:$0xff]  ;;  %v201_v11 = vsel %vm125_vm0, %v85_v9, 0.0  ;;  %v118_v21 = vld [vmem:[%s6458_s0 + $0x1d0] sm:$0xff]  ;;  %v87_v25 = vld [vmem:[%s6458_s0 + $0xd8] sm:$0xff]  ;;  %vm3472_vm2 = vcmask 195712  }
  0x35   :  { %274 = vadd.xlane.f32.xlu1 %v273_v14  ;;  %v153_v12 = vsel %vm125_vm0, %v69_v10, 0.0  ;;  %v117_v13 = vld [vmem:[%s6458_s0 + $0x1c8] sm:$0xff]  ;;  %v119_v29 = vld [vmem:[%s6458_s0 + $0x1d8] sm:$0xff]  ;;  %v88_v33 = vld [vmem:[%s6458_s0 + $0xe0] sm:$0xff]  ;;  %v4961_v2 = vmov 269488144  }
  0x36   :  { %271 = vadd.xlane.f32.xlu0 %v270_v15  ;;  %v101_v14 = vld [vmem:[%s6458_s0 + $0x148] sm:$0xff]  ;;  %v297_v15 = vsel %vm125_vm0, %v117_v13, 0.0  ;;  %v103_v30 = vld [vmem:[%s6458_s0 + $0x158] sm:$0xff]  ;;  %v72_v34 = vld [vmem:[%s6458_s0 + $0x60] sm:$0xff]  ;;  %v4963_v6 = vmov 1414812756  }
  0x37   :  { %v249_v16 = vsel %vm125_vm0, %v101_v14, 0.0  ;;  %v120_v37 = vld [vmem:[%s6458_s0 + $0x1e0] sm:$0xff]  ;;  %v89_v41 = vld [vmem:[%s6458_s0 + $0xe8] sm:$0xff]  ;;  %v90_v49 = vld [vmem:[%s6458_s0 + $0xf0] sm:$0xff]  ;;  %v5289_v10 = vshrl.u32 %v385_v1, 7  ;;  %vm3479_vm3 = vcmask 261312  }
  0x38   :  { %v104_v38 = vld [vmem:[%s6458_s0 + $0x160] sm:$0xff]  ;;  %v73_v42 = vld [vmem:[%s6458_s0 + $0x68] sm:$0xff]  ;;  %v74_v50 = vld [vmem:[%s6458_s0 + $0x70] sm:$0xff]  ;;  %vm3486_vm4 = vcmask 326912   ;;  %vm3493_vm5 = vcmask 392512   ;;  %vm3500_vm6 = vcmask 458112  }
  0x39   :  { %181 = vadd.xlane.f32.xlu1 %v180_v18  ;;  %v70_v18 = vld [vmem:[%s6458_s0 + $0x50] sm:$0xff]  ;;  %v121_v45 = vld [vmem:[%s6458_s0 + $0x1e8] sm:$0xff]  ;;  %v91_v57 = vld [vmem:[%s6458_s0 + $0xf8] sm:$0xff]  ;;  %vm3507_vm7 = vcmask 523712   ;;  %vm3514_vm8 = vcmask 589312   ;;  %vm3521_vm9 = vcmask 654912  }
  0x3a   :  { %133 = vadd.xlane.f32.xlu0 %v132_v19  ;;  %v204_v19 = vsel %vm125_vm0, %v86_v17, 0.0  ;;  %v156_v20 = vsel %vm125_vm0, %v70_v18, 0.0  ;;  %v105_v46 = vld [vmem:[%s6458_s0 + $0x168] sm:$0xff]  ;;  %v122_v53 = vld [vmem:[%s6458_s0 + $0x1f0] sm:$0xff]  ;;  %v75_v58 = vld [vmem:[%s6458_s0 + $0x78] sm:$0xff]  ;;  %vm3528_vm10 = vcmask 720512  }
  0x3b   :  { %v106_v54 = vld [vmem:[%s6458_s0 + $0x170] sm:$0xff]  ;;  %v123_v61 = vld [vmem:[%s6458_s0 + $0x1f8] sm:$0xff]  ;;  %vm3535_vm11 = vcmask 786112   ;;  %vm3542_vm12 = vcmask 851712   ;;  %vm3549_vm13 = vcmask 917312   ;;  %vm3556_vm14 = vcmask 982912  }
  0x3c   :  { %v107_v62 = vld [vmem:[%s6458_s0 + $0x178] sm:$0xff]  ;;  %vm3563_vm15 = vcmask 1048512  }
  0x3d   :  { %277 = vadd.xlane.f32.xlu1 %v276_v22  ;;  %v102_v22 = vld [vmem:[%s6458_s0 + $0x150] sm:$0xff] }
  0x3e   :  { %229 = vadd.xlane.f32.xlu0 %v228_v23  ;;  %v300_v23 = vsel %vm125_vm0, %v118_v21, 0.0  ;;  %v252_v24 = vsel %vm125_vm0, %v102_v22, 0.0 }
  0x41   :  { %184 = vadd.xlane.f32.xlu1 %v183_v26  ;;  %v71_v26 = vld [vmem:[%s6458_s0 + $0x58] sm:$0xff] }
  0x42   :  { %136 = vadd.xlane.f32.xlu0 %v135_v27  ;;  %v207_v27 = vsel %vm125_vm0, %v87_v25, 0.0  ;;  %v159_v28 = vsel %vm125_vm0, %v71_v26, 0.0 }
  0x45   :  { %280 = vadd.xlane.f32.xlu1 %v279_v31  ;;  %v303_v31 = vsel %vm125_vm0, %v119_v29, 0.0 }
  0x46   :  { %232 = vadd.xlane.f32.xlu0 %v231_v32  ;;  %v255_v32 = vsel %vm125_vm0, %v103_v30, 0.0 }
  0x49   :  { %187 = vadd.xlane.f32.xlu1 %v186_v35  ;;  %v210_v35 = vsel %vm125_vm0, %v88_v33, 0.0 }
  0x4a   :  { %139 = vadd.xlane.f32.xlu0 %v138_v36  ;;  %v162_v36 = vsel %vm125_vm0, %v72_v34, 0.0 }
  0x4d   :  { %283 = vadd.xlane.f32.xlu1 %v282_v39  ;;  %v306_v39 = vsel %vm125_vm0, %v120_v37, 0.0 }
  0x4e   :  { %235 = vadd.xlane.f32.xlu0 %v234_v40  ;;  %v258_v40 = vsel %vm125_vm0, %v104_v38, 0.0 }
  0x51   :  { %190 = vadd.xlane.f32.xlu1 %v189_v43  ;;  %v213_v43 = vsel %vm125_vm0, %v89_v41, 0.0 }
  0x52   :  { %142 = vadd.xlane.f32.xlu0 %v141_v44  ;;  %v165_v44 = vsel %vm125_vm0, %v73_v42, 0.0 }
  0x55   :  { %286 = vadd.xlane.f32.xlu1 %v285_v47  ;;  %v309_v47 = vsel %vm125_vm0, %v121_v45, 0.0 }
  0x56   :  { %238 = vadd.xlane.f32.xlu0 %v237_v48  ;;  %v261_v48 = vsel %vm125_vm0, %v105_v46, 0.0 }
  0x59   :  { %193 = vadd.xlane.f32.xlu1 %v192_v51  ;;  %v216_v51 = vsel %vm125_vm0, %v90_v49, 0.0 }
  0x5a   :  { %145 = vadd.xlane.f32.xlu0 %v144_v52  ;;  %v168_v52 = vsel %vm125_vm0, %v74_v50, 0.0 }
  0x5d   :  { %289 = vadd.xlane.f32.xlu1 %v288_v55  ;;  %v312_v55 = vsel %vm125_vm0, %v122_v53, 0.0 }
  0x5e   :  { %241 = vadd.xlane.f32.xlu0 %v240_v56  ;;  %v264_v56 = vsel %vm125_vm0, %v106_v54, 0.0 }
  0x61   :  { %196 = vadd.xlane.f32.xlu1 %v195_v59  ;;  %v219_v59 = vsel %vm125_vm0, %v91_v57, 0.0 }
  0x62   :  { %148 = vadd.xlane.f32.xlu0 %v147_v60  ;;  %v171_v60 = vsel %vm125_vm0, %v75_v58, 0.0 }
  0x65   :  { %292 = vadd.xlane.f32.xlu1 %v291_v63  ;;  %v315_v63 = vsel %vm125_vm0, %v123_v61, 0.0 }
  0x66   :  { %244 = vadd.xlane.f32.xlu0 %v243_v0  ;;  %v267_v0 = vsel %vm125_vm0, %v107_v62, 0.0  ;;  %vm3802_vm0 = vcmask 1041409  }
  0x69   :  { %199 = vadd.xlane.f32.xlu1 %v198_v3  ;;  %v383_v3 = vunpack.c.l.s4 %v4961_v2 }
  0x6a   :  { %151 = vadd.xlane.f32.xlu0 %v150_v4  ;;  %v4962_v4 = vmov 842150450  }
  0x6b   :  { %v390_v5 = vunpack.c.l.s4 %v4962_v4 }
  0x6d   :  { %295 = vadd.xlane.f32.xlu1 %v294_v7  ;;  %v397_v7 = vunpack.c.l.s4 %v4963_v6 }
  0x6e   :  { %247 = vadd.xlane.f32.xlu0 %v246_v8  ;;  %v4964_v8 = vmov 1987475062  }
  0x6f   :  { %v404_v9 = vunpack.c.l.s4 %v4964_v8  ;;  %v398_v13 = vunpack.c.0.s8 %v397_v7 }
  0x71   :  { %202 = vadd.xlane.f32.xlu1 %v201_v11  ;;  %v384_v11 = vunpack.c.0.s8 %v383_v3  ;;  %v405_v14 = vunpack.c.0.s8 %v404_v9 }
  0x72   :  { %154 = vadd.xlane.f32.xlu0 %v153_v12  ;;  %v391_v12 = vunpack.c.0.s8 %v390_v5 }
  0x73   :  { %v5292_v17 = vsub.s32 %v384_v11, %v5289_v10 }
  0x74   :  { %v5295_v18 = vsub.s32 %v391_v12, %v5289_v10 }
  0x75   :  { %298 = vadd.xlane.f32.xlu1 %v297_v15  ;;  %v4965_v15 = vmov 1983009808  }
  0x76   :  { %250 = vadd.xlane.f32.xlu0 %v249_v16  ;;  %v2177_v16 = vunpack.c.l.s4 %v4965_v15 }
  0x78   :  { %v2178_v21 = vunpack.c.0.s8 %v2177_v16 }
  0x79   :  { %205 = vadd.xlane.f32.xlu1 %v204_v19  ;;  %v5298_v19 = vsub.s32 %v398_v13, %v5289_v10 }
  0x7a   :  { %157 = vadd.xlane.f32.xlu0 %v156_v20  ;;  %v5301_v20 = vsub.s32 %v405_v14, %v5289_v10 }
  0x7d   :  { %301 = vadd.xlane.f32.xlu1 %v300_v23 }
  0x7e   :  { %253 = vadd.xlane.f32.xlu0 %v252_v24 }
  0x81   :  { %208 = vadd.xlane.f32.xlu1 %v207_v27 }
  0x82   :  { %160 = vadd.xlane.f32.xlu0 %v159_v28 }
  0x85   :  { %304 = vadd.xlane.f32.xlu1 %v303_v31 }
  0x86   :  { %256 = vadd.xlane.f32.xlu0 %v255_v32  ;;  %v5312_v32 = vsub.s32 %v2178_v21, %v5289_v10 }
  0x89   :  { %211 = vadd.xlane.f32.xlu1 %v210_v35 }
  0x8a   :  { %163 = vadd.xlane.f32.xlu0 %v162_v36 }
  0x8d   :  { %307 = vadd.xlane.f32.xlu1 %v306_v39 }
  0x8e   :  { %259 = vadd.xlane.f32.xlu0 %v258_v40 }
  0x91   :  { %214 = vadd.xlane.f32.xlu1 %v213_v43 }
  0x92   :  { %166 = vadd.xlane.f32.xlu0 %v165_v44 }
  0x95   :  { %310 = vadd.xlane.f32.xlu1 %v309_v47 }
  0x96   :  { %262 = vadd.xlane.f32.xlu0 %v261_v48 }
  0x99   :  { %217 = vadd.xlane.f32.xlu1 %v216_v51 }
  0x9a   :  { %169 = vadd.xlane.f32.xlu0 %v168_v52 }
  0x9d   :  { %313 = vadd.xlane.f32.xlu1 %v312_v55 }
  0x9e   :  { %265 = vadd.xlane.f32.xlu0 %v264_v56 }
  0xa1   :  { %220 = vadd.xlane.f32.xlu1 %v219_v59 }
  0xa2   :  { %172 = vadd.xlane.f32.xlu0 %v171_v60 }
  0xa5   :  { %316 = vadd.xlane.f32.xlu1 %v315_v63 }
  0xa6   :  { %268 = vadd.xlane.f32.xlu0 %v267_v0 }
  0xb6   :  { %v176_v22 = vpop.xlane.xlu1 %175 }
  0xb7   :  { %v128_v23 = vpop.xlane.xlu0 %127  ;;  %v836_v24 = vrot.slane %v176_v22, %v5292_v17  ;;  %v843_v25 = vrot.slane %v176_v22, %v5295_v18  ;;  %v850_v26 = vrot.slane %v176_v22, %v5298_v19  ;;  %v857_v27 = vrot.slane %v176_v22, %v5301_v20 }
  0xb8   :  { %v388_v28 = vrot.slane %v128_v23, %v5292_v17  ;;  %v395_v29 = vrot.slane %v128_v23, %v5295_v18  ;;  %v402_v30 = vrot.slane %v128_v23, %v5298_v19  ;;  %v409_v31 = vrot.slane %v128_v23, %v5301_v20 }
  0xb9   :  { %v2446_v37 = vcombine.low %v836_v24, %v843_v25  ;;  %v2447_v38 = vcombine.low %v850_v26, %v857_v27 }
  0xba   :  { %v179_v33 = vpop.xlane.xlu1 %178  ;;  %v2174_v35 = vcombine.low %v388_v28, %v395_v29  ;;  %v2175_v36 = vcombine.low %v402_v30, %v409_v31 }
  0xbb   :  { %v131_v34 = vpop.xlane.xlu0 %130  ;;  %v864_v39 = vrot.slane %v179_v33, %v5292_v17  ;;  %v871_v40 = vrot.slane %v179_v33, %v5295_v18  ;;  %v878_v41 = vrot.slane %v179_v33, %v5298_v19  ;;  %v885_v42 = vrot.slane %v179_v33, %v5301_v20 }
  0xbc   :  { %v416_v43 = vrot.slane %v131_v34, %v5292_v17  ;;  %v423_v44 = vrot.slane %v131_v34, %v5295_v18  ;;  %v430_v45 = vrot.slane %v131_v34, %v5298_v19  ;;  %v437_v46 = vrot.slane %v131_v34, %v5301_v20 }
  0xbd   :  { %v2182_v47 = vrot.slane %v2174_v35, %v5312_v32  ;;  %v2189_v48 = vrot.slane %v2175_v36, %v5312_v32  ;;  %v2454_v53 = vrot.slane %v2446_v37, %v5312_v32  ;;  %v2461_v55 = vrot.slane %v2447_v38, %v5312_v32 }
  0xbe   :  { %v227_v49 = vpop.xlane.xlu1 %226  ;;  %v2191_v50 = vcombine.low %v416_v43, %v423_v44  ;;  %v2192_v51 = vcombine.low %v430_v45, %v437_v46  ;;  %v2463_v56 = vcombine.low %v864_v39, %v871_v40  ;;  %v2464_v57 = vcombine.low %v878_v41, %v885_v42 }
  0xbf   :  { %v224_v52 = vpop.xlane.xlu0 %223  ;;  %v1312_v54 = vrot.slane %v227_v49, %v5292_v17  ;;  %v1319_v58 = vrot.slane %v227_v49, %v5295_v18  ;;  %v2190_v59 = vcombine.low %v2182_v47, %v2189_v48  ;;  %v1326_v6 = vrot.slane %v227_v49, %v5298_v19 }
  0xc0   :  { %v2199_v60 = vrot.slane %v2191_v50, %v5312_v32  ;;  %v2206_v61 = vrot.slane %v2192_v51, %v5312_v32  ;;  %v1284_v62 = vrot.slane %v224_v52, %v5292_v17  ;;  %v1291_v63 = vrot.slane %v224_v52, %v5295_v18 }
  0xc1   :  { %v1298_v0 = vrot.slane %v224_v52, %v5298_v19  ;;  %v1305_v2 = vrot.slane %v224_v52, %v5301_v20  ;;  %3263 = vperm.xlu0 %4880, %v2190_v59   ;;  %v1333_v7 = vrot.slane %v227_v49, %v5301_v20  ;;  %v2462_v8 = vcombine.low %v2454_v53, %v2461_v55 }
  0xc2   :  { %v5334_v3 = vpop.xlane.xlu1 %274  ;;  %v2207_v4 = vcombine.low %v2199_v60, %v2206_v61  ;;  %v2471_v9 = vrot.slane %v2463_v56, %v5312_v32  ;;  %v2478_v11 = vrot.slane %v2464_v57, %v5312_v32  ;;  %v2718_v12 = vcombine.low %v1284_v62, %v1291_v63 }
  0xc3   :  { %v272_v5 = vpop.xlane.xlu0 %271  ;;  %v2719_v13 = vcombine.low %v1298_v0, %v1305_v2  ;;  %v2735_v14 = vcombine.low %v1312_v54, %v1319_v58  ;;  %v1760_v29 = vrot.slane %v5334_v3, %v5292_v17  ;;  %v1767_v30 = vrot.slane %v5334_v3, %v5295_v18 }
  0xc4   :  { %3266 = vperm.xlu1 %4881, %v2207_v4   ;;  %v1732_v16 = vrot.slane %v272_v5, %v5292_v17  ;;  %v1739_v21 = vrot.slane %v272_v5, %v5295_v18  ;;  %v1746_v22 = vrot.slane %v272_v5, %v5298_v19  ;;  %v1753_v23 = vrot.slane %v272_v5, %v5301_v20 }
  0xc5   :  { %v2479_v31 = vcombine.low %v2471_v9, %v2478_v11  ;;  %v2736_v33 = vcombine.low %v1326_v6, %v1333_v7  ;;  %v2726_v36 = vrot.slane %v2718_v12, %v5312_v32  ;;  %v2733_v37 = vrot.slane %v2719_v13, %v5312_v32 }
  0xc6   :  { %v182_v15 = vpop.xlane.xlu1 %181  ;;  %v2743_v40 = vrot.slane %v2735_v14, %v5312_v32  ;;  %v2990_v41 = vcombine.low %v1732_v16, %v1739_v21  ;;  %v2991_v42 = vcombine.low %v1746_v22, %v1753_v23  ;;  %v1774_v51 = vrot.slane %v5334_v3, %v5298_v19 }
  0xc7   :  { %v5344_v24 = vpop.xlane.xlu0 %133  ;;  %v892_v25 = vrot.slane %v182_v15, %v5292_v17  ;;  %v899_v26 = vrot.slane %v182_v15, %v5295_v18  ;;  %v906_v27 = vrot.slane %v182_v15, %v5298_v19  ;;  %v913_v28 = vrot.slane %v182_v15, %v5301_v20 }
  0xc8   :  { %3311 = vperm.xlu1 %4881, %v2462_v8   ;;  %v2734_v49 = vcombine.low %v2726_v36, %v2733_v37  ;;  %v2750_v50 = vrot.slane %v2736_v33, %v5312_v32  ;;  %v1781_v52 = vrot.slane %v5334_v3, %v5301_v20  ;;  %v3007_v54 = vcombine.low %v1760_v29, %v1767_v30 }
  0xc9   :  { %v2480_v34 = vcombine.low %v892_v25, %v899_v26  ;;  %v2481_v35 = vcombine.low %v906_v27, %v913_v28  ;;  %v2998_v59 = vrot.slane %v2990_v41, %v5312_v32  ;;  %v3005_v60 = vrot.slane %v2991_v42, %v5312_v32 }
  0xca   :  { %v278_v38 = vpop.xlane.xlu1 %277  ;;  %v2751_v4 = vcombine.low %v2743_v40, %v2750_v50  ;;  %v444_v5 = vrot.slane %v5344_v24, %v5292_v17  ;;  %v451_v6 = vrot.slane %v5344_v24, %v5295_v18  ;;  %v3008_v8 = vcombine.low %v1774_v51, %v1781_v52 }
  0xcb   :  { %v5356_v39 = vpop.xlane.xlu0 %229  ;;  %v1788_v43 = vrot.slane %v278_v38, %v5292_v17  ;;  %v1795_v44 = vrot.slane %v278_v38, %v5295_v18  ;;  %v1802_v45 = vrot.slane %v278_v38, %v5298_v19  ;;  %v1809_v46 = vrot.slane %v278_v38, %v5301_v20 }
  0xcc   :  { %3314 = vperm.xlu1 %4881, %v2479_v31   ;;  %v2488_v47 = vrot.slane %v2480_v34, %v5312_v32  ;;  %v2495_v48 = vrot.slane %v2481_v35, %v5312_v32  ;;  %v458_v9 = vrot.slane %v5344_v24, %v5298_v19  ;;  %v465_v11 = vrot.slane %v5344_v24, %v5301_v20 }
  0xcd   :  { %v3024_v53 = vcombine.low %v1788_v43, %v1795_v44  ;;  %v3025_v57 = vcombine.low %v1802_v45, %v1809_v46  ;;  %v3006_v24 = vcombine.low %v2998_v59, %v3005_v60  ;;  %v1340_v27 = vrot.slane %v5356_v39, %v5292_v17 }
  0xce   :  { %v185_v55 = vpop.xlane.xlu1 %184  ;;  %v2496_v56 = vcombine.low %v2488_v47, %v2495_v48  ;;  %v3015_v29 = vrot.slane %v3007_v54, %v5312_v32  ;;  %v3022_v30 = vrot.slane %v3008_v8, %v5312_v32  ;;  %v1347_v31 = vrot.slane %v5356_v39, %v5295_v18 }
  0xcf   :  { %v5370_v58 = vpop.xlane.xlu0 %136  ;;  %v920_v61 = vrot.slane %v185_v55, %v5292_v17  ;;  %v927_v62 = vrot.slane %v185_v55, %v5295_v18  ;;  %v934_v63 = vrot.slane %v185_v55, %v5298_v19  ;;  %v941_v0 = vrot.slane %v185_v55, %v5301_v20 }
  0xd0   :  { %3317 = vperm.xlu0 %4880, %v2496_v56   ;;  %3359 = vperm.xlu1 %4881, %v2734_v49   ;;  %v3032_v2 = vrot.slane %v3024_v53, %v5312_v32  ;;  %v3039_v3 = vrot.slane %v3025_v57, %v5312_v32  ;;  %v2208_v37 = vcombine.low %v444_v5, %v451_v6 }
  0xd1   :  { %v2497_v7 = vcombine.low %v920_v61, %v927_v62  ;;  %v2498_v14 = vcombine.low %v934_v63, %v941_v0  ;;  %v1354_v43 = vrot.slane %v5356_v39, %v5298_v19  ;;  %v1361_v46 = vrot.slane %v5356_v39, %v5301_v20 }
  0xd2   :  { %v281_v12 = vpop.xlane.xlu1 %280  ;;  %v3040_v13 = vcombine.low %v3032_v2, %v3039_v3  ;;  %v472_v47 = vrot.slane %v5370_v58, %v5292_v17  ;;  %v3023_v48 = vcombine.low %v3015_v29, %v3022_v30  ;;  %v2209_v53 = vcombine.low %v458_v9, %v465_v11 }
  0xd3   :  { %v5388_v15 = vpop.xlane.xlu0 %232  ;;  %v1816_v16 = vrot.slane %v281_v12, %v5292_v17  ;;  %v1823_v21 = vrot.slane %v281_v12, %v5295_v18  ;;  %v1830_v22 = vrot.slane %v281_v12, %v5298_v19  ;;  %v1837_v23 = vrot.slane %v281_v12, %v5301_v20 }
  0xd4   :  { %3413 = vperm.xlu0 %4880, %v3040_v13   ;;  %3362 = vperm.xlu1 %4881, %v2751_v4   ;;  %v2505_v25 = vrot.slane %v2497_v7, %v5312_v32  ;;  %v2512_v26 = vrot.slane %v2498_v14, %v5312_v32  ;;  %v2216_v54 = vrot.slane %v2208_v37, %v5312_v32 }
  0xd5   :  { %v3041_v28 = vcombine.low %v1816_v16, %v1823_v21  ;;  %v3042_v35 = vcombine.low %v1830_v22, %v1837_v23  ;;  %v2223_v62 = vrot.slane %v2209_v53, %v5312_v32  ;;  %v479_v63 = vrot.slane %v5370_v58, %v5295_v18 }
  0xd6   :  { %v188_v33 = vpop.xlane.xlu1 %187  ;;  %v2513_v34 = vcombine.low %v2505_v25, %v2512_v26  ;;  %v486_v0 = vrot.slane %v5370_v58, %v5298_v19  ;;  %v493_v2 = vrot.slane %v5370_v58, %v5301_v20  ;;  %v1368_v3 = vrot.slane %v5388_v15, %v5292_v17 }
  0xd7   :  { %v5402_v36 = vpop.xlane.xlu0 %139  ;;  %v948_v38 = vrot.slane %v188_v33, %v5292_v17  ;;  %v955_v40 = vrot.slane %v188_v33, %v5295_v18  ;;  %v962_v41 = vrot.slane %v188_v33, %v5298_v19  ;;  %v969_v42 = vrot.slane %v188_v33, %v5301_v20 }
  0xd8   :  { %3320 = vperm.xlu0 %4880, %v2513_v34   ;;  %3407 = vperm.xlu1 %4881, %v3006_v24   ;;  %v3049_v44 = vrot.slane %v3041_v28, %v5312_v32  ;;  %v3056_v45 = vrot.slane %v3042_v35, %v5312_v32  ;;  %v2224_v6 = vcombine.low %v2216_v54, %v2223_v62 }
  0xd9   :  { %v2514_v49 = vcombine.low %v948_v38, %v955_v40  ;;  %v2515_v52 = vcombine.low %v962_v41, %v969_v42  ;;  %v2752_v21 = vcombine.low %v1340_v27, %v1347_v31  ;;  %v1375_v22 = vrot.slane %v5388_v15, %v5295_v18 }
  0xda   :  { %v284_v50 = vpop.xlane.xlu1 %283  ;;  %v3057_v51 = vcombine.low %v3049_v44, %v3056_v45  ;;  %v1382_v23 = vrot.slane %v5388_v15, %v5298_v19  ;;  %v1389_v25 = vrot.slane %v5388_v15, %v5301_v20  ;;  %v2753_v26 = vcombine.low %v1354_v43, %v1361_v46 }
  0xdb   :  { %v5417_v55 = vpop.xlane.xlu0 %235  ;;  %v1844_v56 = vrot.slane %v284_v50, %v5292_v17  ;;  %v1851_v57 = vrot.slane %v284_v50, %v5295_v18  ;;  %v1858_v59 = vrot.slane %v284_v50, %v5298_v19  ;;  %v1865_v39 = vrot.slane %v284_v50, %v5301_v20 }
  0xdc   :  { %3416 = vperm.xlu0 %4880, %v3057_v51   ;;  %3410 = vperm.xlu1 %4881, %v3023_v48   ;;  %v2522_v60 = vrot.slane %v2514_v49, %v5312_v32  ;;  %v2529_v61 = vrot.slane %v2515_v52, %v5312_v32  ;;  %v500_v24 = vrot.slane %v5402_v36, %v5292_v17 }
  0xdd   :  { %v3058_v7 = vcombine.low %v1844_v56, %v1851_v57  ;;  %v3059_v8 = vcombine.low %v1858_v59, %v1865_v39  ;;  %v2760_v30 = vrot.slane %v2752_v21, %v5312_v32  ;;  %v2767_v15 = vrot.slane %v2753_v26, %v5312_v32 }
  0xde   :  { %v191_v4 = vpop.xlane.xlu1 %190  ;;  %v2530_v5 = vcombine.low %v2522_v60, %v2529_v61  ;;  %v2225_v41 = vcombine.low %v472_v47, %v479_v63  ;;  %v507_v42 = vrot.slane %v5402_v36, %v5295_v18  ;;  %v514_v43 = vrot.slane %v5402_v36, %v5298_v19 }
  0xdf   :  { %v5434_v9 = vpop.xlane.xlu0 %142  ;;  %v976_v11 = vrot.slane %v191_v4, %v5292_v17  ;;  %v983_v12 = vrot.slane %v191_v4, %v5295_v18  ;;  %v990_v13 = vrot.slane %v191_v4, %v5298_v19  ;;  %v997_v14 = vrot.slane %v191_v4, %v5301_v20 }
  0xe0   :  { %3323 = vperm.xlu0 %4880, %v2530_v5   ;;  %3269 = vperm.xlu1 %4881, %v2224_v6   ;;  %v3066_v58 = vrot.slane %v3058_v7, %v5312_v32  ;;  %v3073_v16 = vrot.slane %v3059_v8, %v5312_v32  ;;  %v521_v44 = vrot.slane %v5402_v36, %v5301_v20 }
  0xe1   :  { %v2531_v33 = vcombine.low %v976_v11, %v983_v12  ;;  %v2532_v38 = vcombine.low %v990_v13, %v997_v14  ;;  %v2226_v45 = vcombine.low %v486_v0, %v493_v2  ;;  %v1396_v46 = vrot.slane %v5417_v55, %v5292_v17 }
  0xe2   :  { %v287_v28 = vpop.xlane.xlu1 %286  ;;  %v3074_v29 = vcombine.low %v3066_v58, %v3073_v16  ;;  %v2768_v48 = vcombine.low %v2760_v30, %v2767_v15  ;;  %v2233_v51 = vrot.slane %v2225_v41, %v5312_v32  ;;  %v1403_v52 = vrot.slane %v5417_v55, %v5295_v18 }
  0xe3   :  { %v5451_v34 = vpop.xlane.xlu0 %238  ;;  %v1872_v27 = vrot.slane %v287_v28, %v5292_v17  ;;  %v1879_v31 = vrot.slane %v287_v28, %v5295_v18  ;;  %v1886_v35 = vrot.slane %v287_v28, %v5298_v19  ;;  %v1893_v37 = vrot.slane %v287_v28, %v5301_v20 }
  0xe4   :  { %3419 = vperm.xlu0 %4880, %v3074_v29   ;;  %v2539_v40 = vrot.slane %v2531_v33, %v5312_v32  ;;  %v2546_v50 = vrot.slane %v2532_v38, %v5312_v32  ;;  %v1410_v53 = vrot.slane %v5417_v55, %v5298_v19  ;;  %3365 = vperm.xlu1 %4881, %v2768_v48  }
  0xe5   :  { %v2240_v57 = vrot.slane %v2226_v45, %v5312_v32  ;;  %v3075_v59 = vcombine.low %v1872_v27, %v1879_v31  ;;  %v3076_v39 = vcombine.low %v1886_v35, %v1893_v37  ;;  %v2769_v62 = vcombine.low %v1368_v3, %v1375_v22 }
  0xe6   :  { %v194_v49 = vpop.xlane.xlu1 %193  ;;  %v2547_v56 = vcombine.low %v2539_v40, %v2546_v50  ;;  %v2770_v63 = vcombine.low %v1382_v23, %v1389_v25  ;;  %v1417_v0 = vrot.slane %v5417_v55, %v5301_v20  ;;  %v528_v8 = vrot.slane %v5434_v9, %v5292_v17 }
  0xe7   :  { %v5469_v47 = vpop.xlane.xlu0 %145  ;;  %v1004_v36 = vrot.slane %v194_v49, %v5292_v17  ;;  %v1011_v54 = vrot.slane %v194_v49, %v5295_v18  ;;  %v1018_v60 = vrot.slane %v194_v49, %v5298_v19  ;;  %v1025_v61 = vrot.slane %v194_v49, %v5301_v20 }
  0xe8   :  { %3326 = vperm.xlu0 %4880, %v2547_v56   ;;  %v2241_v2 = vcombine.low %v2233_v51, %v2240_v57  ;;  %v3083_v5 = vrot.slane %v3075_v59, %v5312_v32  ;;  %v3090_v6 = vrot.slane %v3076_v39, %v5312_v32  ;;  %v535_v11 = vrot.slane %v5434_v9, %v5295_v18 }
  0xe9   :  { %v542_v3 = vrot.slane %v5434_v9, %v5298_v19  ;;  %v549_v12 = vrot.slane %v5434_v9, %v5301_v20  ;;  %v2777_v58 = vrot.slane %v2769_v62, %v5312_v32  ;;  %v2784_v16 = vrot.slane %v2770_v63, %v5312_v32 }
  0xea   :  { %v290_v4 = vpop.xlane.xlu1 %289  ;;  %3272 = vperm.xlu1 %4881, %v2241_v2   ;;  %v3091_v14 = vcombine.low %v3083_v5, %v3090_v6  ;;  %v2548_v22 = vcombine.low %v1004_v36, %v1011_v54  ;;  %v2549_v23 = vcombine.low %v1018_v60, %v1025_v61  ;;  %v2242_v25 = vcombine.low %v500_v24, %v507_v42 }
  0xeb   :  { %v5484_v7 = vpop.xlane.xlu0 %241  ;;  %v1900_v13 = vrot.slane %v290_v4, %v5292_v17  ;;  %v1907_v21 = vrot.slane %v290_v4, %v5295_v18  ;;  %v1914_v26 = vrot.slane %v290_v4, %v5298_v19  ;;  %v1921_v28 = vrot.slane %v290_v4, %v5301_v20 }
  0xec   :  { %3422 = vperm.xlu0 %4880, %v3091_v14   ;;  %v2785_v29 = vcombine.low %v2777_v58, %v2784_v16  ;;  %v2243_v33 = vcombine.low %v514_v43, %v521_v44  ;;  %v1424_v31 = vrot.slane %v5451_v34, %v5292_v17  ;;  %v1431_v35 = vrot.slane %v5451_v34, %v5295_v18 }
  0xed   :  { %v1438_v37 = vrot.slane %v5451_v34, %v5298_v19  ;;  %v556_v24 = vrot.slane %v5469_v47, %v5292_v17  ;;  %v2556_v15 = vrot.slane %v2548_v22, %v5312_v32  ;;  %v2563_v38 = vrot.slane %v2549_v23, %v5312_v32 }
  0xee   :  { %v197_v30 = vpop.xlane.xlu1 %196  ;;  %3368 = vperm.xlu1 %4881, %v2785_v29   ;;  %v2250_v40 = vrot.slane %v2242_v25, %v5312_v32  ;;  %v2257_v41 = vrot.slane %v2243_v33, %v5312_v32  ;;  %v563_v44 = vrot.slane %v5469_v47, %v5295_v18  ;;  %v3092_v45 = vcombine.low %v1900_v13, %v1907_v21 }
  0xef   :  { %v5500_v27 = vpop.xlane.xlu0 %148  ;;  %v1032_v42 = vrot.slane %v197_v30, %v5292_v17  ;;  %v1039_v43 = vrot.slane %v197_v30, %v5295_v18  ;;  %v2564_v48 = vcombine.low %v2556_v15, %v2563_v38  ;;  %v3093_v51 = vcombine.low %v1914_v26, %v1921_v28 }
  0xf0   :  { %v2258_v49 = vcombine.low %v2250_v40, %v2257_v41  ;;  %v2786_v36 = vcombine.low %v1396_v46, %v1403_v52  ;;  %v1445_v56 = vrot.slane %v5451_v34, %v5301_v20  ;;  %v570_v57 = vrot.slane %v5469_v47, %v5298_v19 }
  0xf1   :  { %v577_v59 = vrot.slane %v5469_v47, %v5301_v20  ;;  %v1452_v39 = vrot.slane %v5484_v7, %v5292_v17  ;;  %v1046_v60 = vrot.slane %v197_v30, %v5298_v19  ;;  %3329 = vperm.xlu0 %4880, %v2564_v48   ;;  %v1459_v46 = vrot.slane %v5484_v7, %v5295_v18 }
  0xf2   :  { %v293_v50 = vpop.xlane.xlu1 %292  ;;  %3275 = vperm.xlu1 %4881, %v2258_v49   ;;  %v3100_v52 = vrot.slane %v3092_v45, %v5312_v32  ;;  %v1053_v61 = vrot.slane %v197_v30, %v5301_v20  ;;  %v3107_v62 = vrot.slane %v3093_v51, %v5312_v32  ;;  %v2787_v47 = vcombine.low %v1410_v53, %v1417_v0 }
  0xf3   :  { %v5521_v54 = vpop.xlane.xlu0 %244  ;;  %v2794_v63 = vrot.slane %v2786_v36, %v5312_v32  ;;  %v5541_v2 = vcombine.low %v556_v24, %v563_v44  ;;  %v1466_v4 = vrot.slane %v5484_v7, %v5298_v19  ;;  %v1473_v5 = vrot.slane %v5484_v7, %v5301_v20 }
  0xf4   :  { %v2565_v13 = vcombine.low %v1032_v42, %v1039_v43  ;;  %v5551_v58 = vcombine.low %v570_v57, %v577_v59  ;;  %v1928_v55 = vrot.slane %v293_v50, %v5292_v17  ;;  %v3108_v53 = vcombine.low %v3100_v52, %v3107_v62 }
  0xf5   :  { %v2801_v0 = vrot.slane %v2787_v47, %v5312_v32  ;;  %v1935_v16 = vrot.slane %v293_v50, %v5295_v18  ;;  %v1942_v21 = vrot.slane %v293_v50, %v5298_v19  ;;  %v1949_v22 = vrot.slane %v293_v50, %v5301_v20 }
  0xf6   :  { %v5547_v6 = vpop.xlane.xlu1 %199  ;;  %v5558_v23 = vcombine.low %v1452_v39, %v1459_v46  ;;  %3425 = vperm.xlu0 %4880, %v3108_v53   ;;  %v2566_v25 = vcombine.low %v1046_v60, %v1053_v61  ;;  %v2573_v26 = vrot.slane %v2565_v13, %v5312_v32  ;;  %v2259_v28 = vcombine.low %v528_v8, %v535_v11 }
  0xf7   :  { %v5549_v14 = vpop.xlane.xlu0 %151  ;;  %v2802_v7 = vcombine.low %v2794_v63, %v2801_v0  ;;  %v5567_v29 = vcombine.low %v1466_v4, %v1473_v5  ;;  %v584_v30 = vrot.slane %v5500_v27, %v5292_v17  ;;  %v591_v33 = vrot.slane %v5500_v27, %v5295_v18 }
  0xf8   :  { %v2260_v24 = vcombine.low %v542_v3, %v549_v12  ;;  %v598_v8 = vrot.slane %v5500_v27, %v5298_v19  ;;  %v605_v11 = vrot.slane %v5500_v27, %v5301_v20  ;;  %v2580_v40 = vrot.slane %v2566_v25, %v5312_v32 }
  0xf9   :  { %3371 = vperm.xlu1 %4881, %v2802_v7   ;;  %v2267_v41 = vrot.slane %v2259_v28, %v5312_v32  ;;  %v1060_v42 = vrot.slane %v5547_v6, %v5292_v17  ;;  %v1067_v9 = vrot.slane %v5547_v6, %v5295_v18  ;;  %v1074_v3 = vrot.slane %v5547_v6, %v5298_v19 }
  0xfa   :  { %v5579_v15 = vpop.xlane.xlu1 %295  ;;  %v2274_v12 = vrot.slane %v2260_v24, %v5312_v32  ;;  %v1081_v43 = vrot.slane %v5547_v6, %v5301_v20  ;;  %v2581_v44 = vcombine.low %v2573_v26, %v2580_v40  ;;  %v3109_v27 = vcombine.low %v1928_v55, %v1935_v16 }
  0xfb   :  { %v5581_v38 = vpop.xlane.xlu0 %247  ;;  %v3110_v45 = vcombine.low %v1942_v21, %v1949_v22  ;;  %v5598_v48 = vcombine.low %v584_v30, %v591_v33  ;;  %v2803_v50 = vcombine.low %v1424_v31, %v1431_v35  ;;  %v2804_v51 = vcombine.low %v1438_v37, %v1445_v56 }
  0xfc   :  { %v2275_v49 = vcombine.low %v2267_v41, %v2274_v12  ;;  %v5611_v59 = vcombine.low %v598_v8, %v605_v11  ;;  %3332 = vperm.xlu0 %4880, %v2581_v44   ;;  %v1480_v39 = vrot.slane %v5521_v54, %v5292_v17  ;;  %v3117_v60 = vrot.slane %v3109_v27, %v5312_v32 }
  0xfd   :  { %v3124_v46 = vrot.slane %v3110_v45, %v5312_v32  ;;  %v1487_v31 = vrot.slane %v5521_v54, %v5295_v18  ;;  %v1494_v34 = vrot.slane %v5521_v54, %v5298_v19  ;;  %v2811_v35 = vrot.slane %v2803_v50, %v5312_v32 }
  0xfe   :  { %v203_v36 = vpop.xlane.xlu1 %202  ;;  %3278 = vperm.xlu1 %4881, %v2275_v49   ;;  %v2818_v37 = vrot.slane %v2804_v51, %v5312_v32  ;;  %v1501_v56 = vrot.slane %v5521_v54, %v5301_v20  ;;  %v1956_v47 = vrot.slane %v5579_v15, %v5292_v17  ;;  %v1963_v55 = vrot.slane %v5579_v15, %v5295_v18 }
  0xff   :  { %v5609_v57 = vpop.xlane.xlu0 %154  ;;  %v3125_v52 = vcombine.low %v3117_v60, %v3124_v46  ;;  %v1088_v61 = vrot.slane %v203_v36, %v5292_v17  ;;  %v1095_v62 = vrot.slane %v203_v36, %v5295_v18  ;;  %v1102_v4 = vrot.slane %v203_v36, %v5298_v19 }
 0x100   :  { %v2819_v63 = vcombine.low %v2811_v35, %v2818_v37  ;;  %v1109_v5 = vrot.slane %v203_v36, %v5301_v20  ;;  %v2582_v54 = vcombine.low %v1060_v42, %v1067_v9  ;;  %v2583_v53 = vcombine.low %v1074_v3, %v1081_v43 }
 0x101   :  { %3428 = vperm.xlu0 %4880, %v3125_v52   ;;  %v2284_v0 = vrot.slane %v5541_v2, %v5312_v32  ;;  %v1970_v16 = vrot.slane %v5579_v15, %v5298_v19  ;;  %v1977_v21 = vrot.slane %v5579_v15, %v5301_v20  ;;  %v5641_v22 = vcombine.low %v1480_v39, %v1487_v31 }
 0x102   :  { %v299_v6 = vpop.xlane.xlu1 %298  ;;  %3374 = vperm.xlu1 %4881, %v2819_v63   ;;  %v2291_v7 = vrot.slane %v5551_v58, %v5312_v32  ;;  %v5645_v25 = vcombine.low %v1494_v34, %v1501_v56  ;;  %v2599_v26 = vcombine.low %v1088_v61, %v1095_v62  ;;  %v2590_v28 = vrot.slane %v2582_v54, %v5312_v32 }
 0x103   :  { %v5631_v13 = vpop.xlane.xlu0 %250  ;;  %v2597_v30 = vrot.slane %v2583_v53, %v5312_v32  ;;  %v2600_v2 = vcombine.low %v1102_v4, %v1109_v5  ;;  %v612_v33 = vrot.slane %v5549_v14, %v5292_v17  ;;  %v619_v24 = vrot.slane %v5549_v14, %v5295_v18 }
 0x104   :  { %v2292_v15 = vcombine.low %v2284_v0, %v2291_v7  ;;  %v626_v58 = vrot.slane %v5549_v14, %v5298_v19  ;;  %v633_v40 = vrot.slane %v5549_v14, %v5301_v20  ;;  %v1984_v42 = vrot.slane %v299_v6, %v5292_v17 }
 0x105   :  { %v2598_v41 = vcombine.low %v2590_v28, %v2597_v30  ;;  %v1991_v9 = vrot.slane %v299_v6, %v5295_v18  ;;  %v3126_v3 = vcombine.low %v1956_v47, %v1963_v55  ;;  %v3127_v12 = vcombine.low %v1970_v16, %v1977_v21 }
 0x106   :  { %v206_v8 = vpop.xlane.xlu1 %205  ;;  %3281 = vperm.xlu1 %4881, %v2292_v15   ;;  %v2828_v43 = vrot.slane %v5558_v23, %v5312_v32  ;;  %v1998_v44 = vrot.slane %v299_v6, %v5298_v19  ;;  %v2005_v27 = vrot.slane %v299_v6, %v5301_v20  ;;  %v1508_v45 = vrot.slane %v5581_v38, %v5292_v17 }
 0x107   :  { %v5653_v11 = vpop.xlane.xlu0 %157  ;;  %3335 = vperm.xlu0 %4880, %v2598_v41   ;;  %v2835_v14 = vrot.slane %v5567_v29, %v5312_v32  ;;  %v1515_v49 = vrot.slane %v5581_v38, %v5295_v18  ;;  %v1522_v50 = vrot.slane %v5581_v38, %v5298_v19  ;;  %v3134_v51 = vrot.slane %v3126_v3, %v5312_v32 }
 0x108   :  { %v3141_v23 = vrot.slane %v3127_v12, %v5312_v32  ;;  %v1529_v60 = vrot.slane %v5581_v38, %v5301_v20  ;;  %v1116_v29 = vrot.slane %v206_v8, %v5292_v17  ;;  %v1123_v31 = vrot.slane %v206_v8, %v5295_v18 }
 0x109   :  { %v2836_v46 = vcombine.low %v2828_v43, %v2835_v14  ;;  %v3143_v34 = vcombine.low %v1984_v42, %v1991_v9  ;;  %v1130_v37 = vrot.slane %v206_v8, %v5298_v19  ;;  %v1137_v56 = vrot.slane %v206_v8, %v5301_v20 }
 0x10a   :  { %v5675_v36 = vpop.xlane.xlu1 %301  ;;  %v3142_v35 = vcombine.low %v3134_v51, %v3141_v23  ;;  %v3144_v52 = vcombine.low %v1998_v44, %v2005_v27  ;;  %v2607_v61 = vrot.slane %v2599_v26, %v5312_v32  ;;  %v2614_v62 = vrot.slane %v2600_v2, %v5312_v32 }
 0x10b   :  { %v5677_v39 = vpop.xlane.xlu0 %253  ;;  %3377 = vperm.xlu1 %4881, %v2836_v46   ;;  %v2301_v38 = vrot.slane %v5598_v48, %v5312_v32  ;;  %v2310_v47 = vcombine.low %v612_v33, %v619_v24  ;;  %v2311_v63 = vcombine.low %v626_v58, %v633_v40  ;;  %v5689_v4 = vcombine.low %v1508_v45, %v1515_v49 }
 0x10c   :  { %3431 = vperm.xlu0 %4880, %v3142_v35   ;;  %v2308_v5 = vrot.slane %v5611_v59, %v5312_v32  ;;  %v5695_v54 = vcombine.low %v1522_v50, %v1529_v60  ;;  %v2616_v53 = vcombine.low %v1116_v29, %v1123_v31  ;;  %v640_v0 = vrot.slane %v5609_v57, %v5292_v17 }
 0x10d   :  { %v2615_v16 = vcombine.low %v2607_v61, %v2614_v62  ;;  %v2617_v21 = vcombine.low %v1130_v37, %v1137_v56  ;;  %v647_v48 = vrot.slane %v5609_v57, %v5295_v18  ;;  %v654_v7 = vrot.slane %v5609_v57, %v5298_v19 }
 0x10e   :  { %v209_v6 = vpop.xlane.xlu1 %208  ;;  %v2309_v26 = vcombine.low %v2301_v38, %v2308_v5  ;;  %v2012_v59 = vrot.slane %v5675_v36, %v5292_v17  ;;  %v2019_v28 = vrot.slane %v5675_v36, %v5295_v18  ;;  %v3151_v30 = vrot.slane %v3143_v34, %v5312_v32 }
 0x10f   :  { %v5693_v55 = vpop.xlane.xlu0 %160  ;;  %v3158_v2 = vrot.slane %v3144_v52, %v5312_v32  ;;  %v661_v33 = vrot.slane %v5609_v57, %v5301_v20  ;;  %v2845_v24 = vrot.slane %v5641_v22, %v5312_v32  ;;  %v2852_v15 = vrot.slane %v5645_v25, %v5312_v32 }
 0x110   :  { %3338 = vperm.xlu0 %4880, %v2615_v16   ;;  %3284 = vperm.xlu1 %4881, %v2309_v26   ;;  %v5718_v40 = vand.u32 127, %v385_v1  ;;  %v2026_v41 = vrot.slane %v5675_v36, %v5298_v19  ;;  %v2033_v57 = vrot.slane %v5675_v36, %v5301_v20  ;;  %v1536_v42 = vrot.slane %v5631_v13, %v5292_v17 }
 0x111   :  { %v3159_v9 = vcombine.low %v3151_v30, %v3158_v2  ;;  %v1543_v22 = vrot.slane %v5631_v13, %v5295_v18  ;;  %v1550_v25 = vrot.slane %v5631_v13, %v5298_v19  ;;  %v1557_v1 = vrot.slane %v5631_v13, %v5301_v20 }
 0x112   :  { %v305_v8 = vpop.xlane.xlu1 %304  ;;  %v2853_v3 = vcombine.low %v2845_v24, %v2852_v15  ;;  %v3160_v12 = vcombine.low %v2012_v59, %v2019_v28  ;;  %v1144_v43 = vrot.slane %v209_v6, %v5292_v17  ;;  %v1151_v44 = vrot.slane %v209_v6, %v5295_v18 }
 0x113   :  { %v5715_v58 = vpop.xlane.xlu0 %256  ;;  %v1158_v27 = vrot.slane %v209_v6, %v5298_v19  ;;  %v1165_v45 = vrot.slane %v209_v6, %v5301_v20  ;;  %v2624_v14 = vrot.slane %v2616_v53, %v5312_v32  ;;  %v2631_v49 = vrot.slane %v2617_v21, %v5312_v32 }
 0x114   :  { %3434 = vperm.xlu0 %4880, %v3159_v9   ;;  %3380 = vperm.xlu1 %4881, %v2853_v3   ;;  %v5743_v13 = vadd.s32 4294967288, %v5718_v40  ;;  %v2327_v23 = vcombine.low %v640_v0, %v647_v48  ;;  %v3161_v36 = vcombine.low %v2026_v41, %v2033_v57  ;;  %v2318_v60 = vrot.slane %v2310_v47, %v5312_v32 }
 0x115   :  { %v2325_v46 = vrot.slane %v2311_v63, %v5312_v32  ;;  %v2328_v29 = vcombine.low %v654_v7, %v661_v33  ;;  %v5747_v31 = vcombine.low %v1536_v42, %v1543_v22  ;;  %v5749_v34 = vcombine.low %v1550_v25, %v1557_v1 }
 0x116   :  { %v5738_v50 = vpop.xlane.xlu1 %211  ;;  %v2632_v35 = vcombine.low %v2624_v14, %v2631_v49  ;;  %v2633_v37 = vcombine.low %v1144_v43, %v1151_v44  ;;  %v668_v56 = vrot.slane %v5653_v11, %v5292_v17  ;;  %v675_v52 = vrot.slane %v5653_v11, %v5295_v18 }
 0x117   :  { %v5740_v51 = vpop.xlane.xlu0 %163  ;;  %v2326_v61 = vcombine.low %v2318_v60, %v2325_v46  ;;  %v2634_v62 = vcombine.low %v1158_v27, %v1165_v45  ;;  %v2040_v38 = vrot.slane %v305_v8, %v5292_v17  ;;  %v2047_v47 = vrot.slane %v305_v8, %v5295_v18 }
 0x118   :  { %3341 = vperm.xlu0 %4880, %v2632_v35   ;;  %v3168_v63 = vrot.slane %v3160_v12, %v5312_v32  ;;  %v2054_v6 = vrot.slane %v305_v8, %v5298_v19  ;;  %v2061_v53 = vrot.slane %v305_v8, %v5301_v20  ;;  %v3175_v0 = vrot.slane %v3161_v36, %v5312_v32 }
 0x119   :  { %3287 = vperm.xlu1 %4881, %v2326_v61   ;;  %v2862_v16 = vrot.slane %v5689_v4, %v5312_v32  ;;  %v682_v21 = vrot.slane %v5653_v11, %v5298_v19  ;;  %v689_v48 = vrot.slane %v5653_v11, %v5301_v20  ;;  %v1564_v7 = vrot.slane %v5677_v39, %v5292_v17 }
 0x11a   :  { %v5758_v5 = vpop.xlane.xlu1 %307  ;;  %v2869_v26 = vrot.slane %v5695_v54, %v5312_v32  ;;  %v1571_v28 = vrot.slane %v5677_v39, %v5295_v18  ;;  %v1578_v4 = vrot.slane %v5677_v39, %v5298_v19  ;;  %v1585_v30 = vrot.slane %v5677_v39, %v5301_v20 }
 0x11b   :  { %v5773_v59 = vpop.xlane.xlu0 %259  ;;  %v3176_v2 = vcombine.low %v3168_v63, %v3175_v0  ;;  %v5781_v33 = vcombine.low %v668_v56, %v675_v52  ;;  %v1172_v24 = vrot.slane %v5738_v50, %v5292_v17  ;;  %v1179_v54 = vrot.slane %v5738_v50, %v5295_v18 }
 0x11c   :  { %v2870_v11 = vcombine.low %v2862_v16, %v2869_v26  ;;  %v3177_v8 = vcombine.low %v2040_v38, %v2047_v47  ;;  %v3178_v41 = vcombine.low %v2054_v6, %v2061_v53  ;;  %v2641_v57 = vrot.slane %v2633_v37, %v5312_v32 }
 0x11d   :  { %3437 = vperm.xlu0 %4880, %v3176_v2   ;;  %v2648_v42 = vrot.slane %v2634_v62, %v5312_v32  ;;  %v1186_v39 = vrot.slane %v5738_v50, %v5298_v19  ;;  %v1193_v9 = vrot.slane %v5738_v50, %v5301_v20  ;;  %v2335_v22 = vrot.slane %v2327_v23, %v5312_v32 }
 0x11e   :  { %v5787_v15 = vpop.xlane.xlu1 %214  ;;  %3383 = vperm.xlu1 %4881, %v2870_v11   ;;  %v2342_v25 = vrot.slane %v2328_v29, %v5312_v32  ;;  %v2345_v1 = vcombine.low %v682_v21, %v689_v48  ;;  %v5797_v3 = vcombine.low %v1564_v7, %v1571_v28  ;;  %v5799_v12 = vcombine.low %v1578_v4, %v1585_v30 }
 0x11f   :  { %v2649_v43 = vcombine.low %v2641_v57, %v2648_v42  ;;  %v2650_v44 = vcombine.low %v1172_v24, %v1179_v54  ;;  %v696_v27 = vrot.slane %v5693_v55, %v5292_v17  ;;  %v703_v45 = vrot.slane %v5693_v55, %v5295_v18  ;;  %v5807_v50 = vpop.xlane.xlu0 %166 }
 0x120   :  { %v2343_v14 = vcombine.low %v2335_v22, %v2342_v25  ;;  %v710_v23 = vrot.slane %v5693_v55, %v5298_v19  ;;  %v2068_v36 = vrot.slane %v5758_v5, %v5292_v17  ;;  %v2075_v60 = vrot.slane %v5758_v5, %v5295_v18 }
 0x121   :  { %3344 = vperm.xlu0 %4880, %v2649_v43   ;;  %v3185_v46 = vrot.slane %v3177_v8, %v5312_v32  ;;  %v2651_v29 = vcombine.low %v1186_v39, %v1193_v9  ;;  %v717_v35 = vrot.slane %v5693_v55, %v5301_v20  ;;  %v3192_v37 = vrot.slane %v3178_v41, %v5312_v32 }
 0x122   :  { %v5805_v49 = vpop.xlane.xlu1 %310  ;;  %3290 = vperm.xlu1 %4881, %v2343_v14   ;;  %v2879_v56 = vrot.slane %v5747_v31, %v5312_v32  ;;  %v2082_v52 = vrot.slane %v5758_v5, %v5298_v19  ;;  %v2089_v61 = vrot.slane %v5758_v5, %v5301_v20  ;;  %v1592_v62 = vrot.slane %v5715_v58, %v5292_v17 }
 0x123   :  { %v2886_v38 = vrot.slane %v5749_v34, %v5312_v32  ;;  %v1599_v55 = vrot.slane %v5715_v58, %v5295_v18  ;;  %v1606_v47 = vrot.slane %v5715_v58, %v5298_v19  ;;  %v1613_v31 = vrot.slane %v5715_v58, %v5301_v20  ;;  %v5847_v7 = vpop.xlane.xlu0 %262 }
 0x124   :  { %v3193_v63 = vcombine.low %v3185_v46, %v3192_v37  ;;  %v3194_v6 = vcombine.low %v2068_v36, %v2075_v60  ;;  %v1200_v5 = vrot.slane %v5787_v15, %v5292_v17  ;;  %v1207_v0 = vrot.slane %v5787_v15, %v5295_v18 }
 0x125   :  { %v2887_v53 = vcombine.low %v2879_v56, %v2886_v38  ;;  %v1214_v34 = vrot.slane %v5787_v15, %v5298_v19  ;;  %v1221_v21 = vrot.slane %v5787_v15, %v5301_v20  ;;  %v2658_v58 = vrot.slane %v2650_v44, %v5312_v32 }
 0x126   :  { %v5839_v16 = vpop.xlane.xlu1 %217  ;;  %3440 = vperm.xlu0 %4880, %v3193_v63   ;;  %v2665_v48 = vrot.slane %v2651_v29, %v5312_v32  ;;  %v2361_v26 = vcombine.low %v696_v27, %v703_v45  ;;  %v3195_v28 = vcombine.low %v2082_v52, %v2089_v61  ;;  %v2352_v4 = vrot.slane %v5781_v33, %v5312_v32 }
 0x127   :  { %3386 = vperm.xlu1 %4881, %v2887_v53   ;;  %v2359_v30 = vrot.slane %v2345_v1, %v5312_v32  ;;  %v2362_v2 = vcombine.low %v710_v23, %v717_v35  ;;  %v5852_v11 = vcombine.low %v1592_v62, %v1599_v55  ;;  %v5854_v24 = vcombine.low %v1606_v47, %v1613_v31 }
 0x128   :  { %v2666_v54 = vcombine.low %v2658_v58, %v2665_v48  ;;  %v2667_v15 = vcombine.low %v1200_v5, %v1207_v0  ;;  %v724_v8 = vrot.slane %v5740_v51, %v5292_v17  ;;  %v731_v41 = vrot.slane %v5740_v51, %v5295_v18 }
 0x129   :  { %v2360_v57 = vcombine.low %v2352_v4, %v2359_v30  ;;  %v2668_v42 = vcombine.low %v1214_v34, %v1221_v21  ;;  %v2096_v33 = vrot.slane %v5805_v49, %v5292_v17  ;;  %v2103_v39 = vrot.slane %v5805_v49, %v5295_v18 }
 0x12a   :  { %3347 = vperm.xlu0 %4880, %v2666_v54   ;;  %v3202_v9 = vrot.slane %v3194_v6, %v5312_v32  ;;  %v2110_v22 = vrot.slane %v5805_v49, %v5298_v19  ;;  %v2117_v25 = vrot.slane %v5805_v49, %v5301_v20  ;;  %v3209_v1 = vrot.slane %v3195_v28, %v5312_v32  ;;  %v5872_v44 = vpop.xlane.xlu1 %313  ;;  %v5882_v49 = vpop.xlane.xlu0 %169 }
 0x12b   :  { %3293 = vperm.xlu1 %4881, %v2360_v57   ;;  %v2896_v43 = vrot.slane %v5797_v3, %v5312_v32  ;;  %v738_v27 = vrot.slane %v5740_v51, %v5298_v19  ;;  %v745_v45 = vrot.slane %v5740_v51, %v5301_v20  ;;  %v1620_v14 = vrot.slane %v5773_v59, %v5292_v17 }
 0x12c   :  { %v2903_v23 = vrot.slane %v5799_v12, %v5312_v32  ;;  %v1627_v36 = vrot.slane %v5773_v59, %v5295_v18  ;;  %v1634_v3 = vrot.slane %v5773_v59, %v5298_v19  ;;  %v1641_v60 = vrot.slane %v5773_v59, %v5301_v20 }
 0x12d   :  { %v3210_v46 = vcombine.low %v3202_v9, %v3209_v1  ;;  %v5890_v29 = vcombine.low %v724_v8, %v731_v41  ;;  %v1228_v35 = vrot.slane %v5839_v16, %v5292_v17  ;;  %v1235_v12 = vrot.slane %v5839_v16, %v5295_v18 }
 0x12e   :  { %v2904_v51 = vcombine.low %v2896_v43, %v2903_v23  ;;  %v3211_v37 = vcombine.low %v2096_v33, %v2103_v39  ;;  %v3212_v56 = vcombine.low %v2110_v22, %v2117_v25  ;;  %v2675_v52 = vrot.slane %v2667_v15, %v5312_v32  ;;  %v221_v53 = vpop.xlane.xlu1 %220 }
 0x12f   :  { %3443 = vperm.xlu0 %4880, %v3210_v46   ;;  %v2682_v61 = vrot.slane %v2668_v42, %v5312_v32  ;;  %v1242_v59 = vrot.slane %v5839_v16, %v5298_v19  ;;  %v1249_v62 = vrot.slane %v5839_v16, %v5301_v20  ;;  %v2369_v38 = vrot.slane %v2361_v26, %v5312_v32  ;;  %v5912_v16 = vpop.xlane.xlu0 %265 }
 0x130   :  { %3389 = vperm.xlu1 %4881, %v2904_v51   ;;  %v2376_v55 = vrot.slane %v2362_v2, %v5312_v32  ;;  %v2379_v47 = vcombine.low %v738_v27, %v745_v45  ;;  %v5904_v31 = vcombine.low %v1620_v14, %v1627_v36  ;;  %v5906_v63 = vcombine.low %v1634_v3, %v1641_v60 }
 0x131   :  { %v2683_v6 = vcombine.low %v2675_v52, %v2682_v61  ;;  %v2684_v5 = vcombine.low %v1228_v35, %v1235_v12  ;;  %v752_v0 = vrot.slane %v5807_v50, %v5292_v17  ;;  %v759_v34 = vrot.slane %v5807_v50, %v5295_v18 }
 0x132   :  { %v2377_v21 = vcombine.low %v2369_v38, %v2376_v55  ;;  %v766_v58 = vrot.slane %v5807_v50, %v5298_v19  ;;  %v2124_v48 = vrot.slane %v5872_v44, %v5292_v17  ;;  %v2131_v26 = vrot.slane %v5872_v44, %v5295_v18  ;;  %v317_v1 = vpop.xlane.xlu1 %316 }
 0x133   :  { %3350 = vperm.xlu0 %4880, %v2683_v6   ;;  %v3219_v28 = vrot.slane %v3211_v37, %v5312_v32  ;;  %v2685_v4 = vcombine.low %v1242_v59, %v1249_v62  ;;  %v773_v30 = vrot.slane %v5807_v50, %v5301_v20  ;;  %v3226_v2 = vrot.slane %v3212_v56, %v5312_v32  ;;  %v5946_v45 = vpop.xlane.xlu0 %172 }
 0x134   :  { %3296 = vperm.xlu1 %4881, %v2377_v21   ;;  %v2913_v54 = vrot.slane %v5852_v11, %v5312_v32  ;;  %v2138_v15 = vrot.slane %v5872_v44, %v5298_v19  ;;  %v2145_v8 = vrot.slane %v5872_v44, %v5301_v20  ;;  %v1648_v41 = vrot.slane %v5847_v7, %v5292_v17 }
 0x135   :  { %v2920_v57 = vrot.slane %v5854_v24, %v5312_v32  ;;  %v1655_v50 = vrot.slane %v5847_v7, %v5295_v18  ;;  %v3227_v42 = vcombine.low %v3219_v28, %v3226_v2  ;;  %v1256_v33 = vrot.slane %v221_v53, %v5292_v17 }
 0x136   :  { %v1263_v11 = vrot.slane %v221_v53, %v5295_v18  ;;  %v3228_v39 = vcombine.low %v2124_v48, %v2131_v26  ;;  %v1662_v9 = vrot.slane %v5847_v7, %v5298_v19  ;;  %v1669_v22 = vrot.slane %v5847_v7, %v5301_v20 }
 0x137   :  { %v2921_v25 = vcombine.low %v2913_v54, %v2920_v57  ;;  %3446 = vperm.xlu0 %4880, %v3227_v42   ;;  %v1270_v24 = vrot.slane %v221_v53, %v5298_v19  ;;  %v1277_v43 = vrot.slane %v221_v53, %v5301_v20  ;;  %v2692_v44 = vrot.slane %v2684_v5, %v5312_v32 }
 0x138   :  { %v2699_v27 = vrot.slane %v2685_v4, %v5312_v32  ;;  %v3229_v14 = vcombine.low %v2138_v15, %v2145_v8  ;;  %v780_v23 = vrot.slane %v5882_v49, %v5292_v17  ;;  %v2386_v7 = vrot.slane %v5890_v29, %v5312_v32 }
 0x139   :  { %3392 = vperm.xlu1 %4881, %v2921_v25   ;;  %v2393_v36 = vrot.slane %v2379_v47, %v5312_v32  ;;  %v2701_v3 = vcombine.low %v1256_v33, %v1263_v11  ;;  %v2152_v46 = vrot.slane %v317_v1, %v5292_v17  ;;  %v2159_v51 = vrot.slane %v317_v1, %v5295_v18 }
 0x13a   :  { %v2700_v60 = vcombine.low %v2692_v44, %v2699_v27  ;;  %v787_v35 = vrot.slane %v5882_v49, %v5295_v18  ;;  %v2166_v37 = vrot.slane %v317_v1, %v5298_v19  ;;  %v2173_v56 = vrot.slane %v317_v1, %v5301_v20 }
 0x13b   :  { %v2394_v12 = vcombine.low %v2386_v7, %v2393_v36  ;;  %v2395_v52 = vcombine.low %v752_v0, %v759_v34  ;;  %v2396_v61 = vcombine.low %v766_v58, %v773_v30  ;;  %v2702_v59 = vcombine.low %v1270_v24, %v1277_v43  ;;  %v269_v34 = vpop.xlane.xlu0 %268 }
 0x13c   :  { %3353 = vperm.xlu0 %4880, %v2700_v60   ;;  %v3236_v29 = vrot.slane %v3228_v39, %v5312_v32  ;;  %v2939_v62 = vcombine.low %v1648_v41, %v1655_v50  ;;  %v2940_v38 = vcombine.low %v1662_v9, %v1669_v22  ;;  %v3243_v55 = vrot.slane %v3229_v14, %v5312_v32 }
 0x13d   :  { %3299 = vperm.xlu1 %4881, %v2394_v12   ;;  %v2930_v47 = vrot.slane %v5904_v31, %v5312_v32  ;;  %v794_v6 = vrot.slane %v5882_v49, %v5298_v19  ;;  %v801_v53 = vrot.slane %v5882_v49, %v5301_v20  ;;  %v3245_v5 = vcombine.low %v2152_v46, %v2159_v51 }
 0x13e   :  { %v2937_v0 = vrot.slane %v5906_v63, %v5312_v32  ;;  %v2412_v21 = vcombine.low %v780_v23, %v787_v35  ;;  %v3246_v58 = vcombine.low %v2166_v37, %v2173_v56  ;;  %v3244_v48 = vcombine.low %v3236_v29, %v3243_v55 }
 0x13f   :  { %v2709_v26 = vrot.slane %v2701_v3, %v5312_v32  ;;  %v1676_v31 = vrot.slane %v5912_v16, %v5292_v17  ;;  %v2716_v4 = vrot.slane %v2702_v59, %v5312_v32  ;;  %v2403_v30 = vrot.slane %v2395_v52, %v5312_v32 }
 0x140   :  { %v2938_v28 = vcombine.low %v2930_v47, %v2937_v0  ;;  %v1683_v49 = vrot.slane %v5912_v16, %v5295_v18  ;;  %v1690_v63 = vrot.slane %v5912_v16, %v5298_v19  ;;  %v1697_v2 = vrot.slane %v5912_v16, %v5301_v20  ;;  %3449 = vperm.xlu0 %4880, %v3244_v48   ;;  %v3264_v1 = vpop.permute.xlu0 %3263  ;;  %v3821_v48 = vld [vmem:[#allocation3] sm:$0xff] }
 0x141   :  { %v2410_v54 = vrot.slane %v2396_v61, %v5312_v32  ;;  %v2413_v8 = vcombine.low %v794_v6, %v801_v53  ;;  %v808_v41 = vrot.slane %v5946_v45, %v5292_v17  ;;  %v2717_v57 = vcombine.low %v2709_v26, %v2716_v4  ;;  %v3822_v53 = vld [vmem:[#allocation3 + $0x8] sm:$0xff]  ;;  %v3825_v26 = vld [vmem:[#allocation3 + $0x20] sm:$0xff] }
 0x142   :  { %3395 = vperm.xlu1 %4881, %v2938_v28   ;;  %v3253_v50 = vrot.slane %v3245_v5, %v5312_v32  ;;  %v815_v42 = vrot.slane %v5946_v45, %v5295_v18  ;;  %v3260_v11 = vrot.slane %v3246_v58, %v5312_v32  ;;  %v2947_v16 = vrot.slane %v2939_v62, %v5312_v32  ;;  %v3826_v58 = vld [vmem:[#allocation3 + $0x28] sm:$0xff] }
 0x143   :  { %v3267_v15 = vpop.permute.xlu1 %3266  ;;  %v2411_v33 = vcombine.low %v2403_v30, %v2410_v54  ;;  %v822_v39 = vrot.slane %v5946_v45, %v5298_v19  ;;  %v829_v9 = vrot.slane %v5946_v45, %v5301_v20  ;;  %v2954_v22 = vrot.slane %v2940_v38, %v5312_v32  ;;  %v3830_v28 = vld [vmem:[#allocation3 + $0x48] sm:$0xff] }
 0x144   :  { %v5995_v25 = vsub.s32 %v5718_v40, %v5289_v10  ;;  %v2956_v24 = vcombine.low %v1676_v31, %v1683_v49  ;;  %v2957_v43 = vcombine.low %v1690_v63, %v1697_v2  ;;  %3356 = vperm.xlu0 %4880, %v2717_v57   ;;  %v3261_v44 = vcombine.low %v3253_v50, %v3260_v11  ;;  %v3834_v4 = vld [vmem:[#allocation3 + $0x68] sm:$0xff] }
 0x145   :  { %v5999_v27 = vsub.s32 %v5743_v13, %v5289_v10  ;;  %v2955_v23 = vcombine.low %v2947_v16, %v2954_v22  ;;  %v2420_v45 = vrot.slane %v2412_v21, %v5312_v32  ;;  %v2427_v7 = vrot.slane %v2413_v8, %v5312_v32  ;;  %v3829_v8 = vld [vmem:[#allocation3 + $0x40] sm:$0xff]  ;;  %v3838_v11 = vld [vmem:[#allocation3 + $0x88] sm:$0xff] }
 0x146   :  { %3302 = vperm.xlu1 %4881, %v2411_v33   ;;  %v3467_v36 = vadd.s32 4294967280, %v5718_v40  ;;  %v2429_v3 = vcombine.low %v808_v41, %v815_v42  ;;  %v3459_v60 = vrot.slane %v3264_v1, %v5995_v25  ;;  %v2430_v51 = vcombine.low %v822_v39, %v829_v9  ;;  %v3833_v41 = vld [vmem:[#allocation3 + $0x60] sm:$0xff]  ;;  %v3842_v16 = vld [vmem:[#allocation3 + $0xa8] sm:$0xff] }
 0x147   :  { %v3312_v14 = vpop.permute.xlu1 %3311  ;;  %v3464_v46 = vrot.slane %v3267_v15, %v5999_v27  ;;  %v1704_v35 = vrot.slane %v269_v34, %v5292_v17  ;;  %v1711_v13 = vrot.slane %v269_v34, %v5295_v18  ;;  %v1718_v12 = vrot.slane %v269_v34, %v5298_v19 }
 0x148   :  { %v1725_v37 = vrot.slane %v269_v34, %v5301_v20  ;;  %3452 = vperm.xlu0 %4880, %v3261_v44   ;;  %v2964_v52 = vrot.slane %v2956_v24, %v5312_v32  ;;  %v2971_v61 = vrot.slane %v2957_v43, %v5312_v32  ;;  %v2428_v29 = vcombine.low %v2420_v45, %v2427_v7  ;;  %v3837_v44 = vld [vmem:[#allocation3 + $0x80] sm:$0xff] }
 0x149   :  { %v6011_v56 = vsel %vm3465_vm1, %v3464_v46, %v3459_v60  ;;  %v3568_v62 = vrot.slane %v3312_v14, %v5995_v25  ;;  %v6018_v18 = vsub.s32 %v3467_v36, %v5289_v10  ;;  %v2973_v20 = vcombine.low %v1704_v35, %v1711_v13  ;;  %v3841_v14 = vld [vmem:[#allocation3 + $0xa0] sm:$0xff]  ;;  %v3846_v36 = vld [vmem:[#allocation3 + $0xc8] sm:$0xff] }
 0x14a   :  { %3398 = vperm.xlu1 %4881, %v2955_v23   ;;  %v2974_v38 = vcombine.low %v1718_v12, %v1725_v37  ;;  %v3474_v6 = vadd.s32 4294967272, %v5718_v40  ;;  %v2972_v5 = vcombine.low %v2964_v52, %v2971_v61  ;;  %v2437_v0 = vrot.slane %v2429_v3, %v5312_v32  ;;  %v3850_v3 = vld [vmem:[#allocation3 + $0xe8] sm:$0xff]  ;;  %v3845_v37 = vld [vmem:[#allocation3 + $0xc0] sm:$0xff] }
 0x14b   :  { %v3315_v59 = vpop.permute.xlu1 %3314  ;;  %v2444_v34 = vrot.slane %v2430_v51, %v5312_v32  ;;  %v2981_v30 = vrot.slane %v2973_v20, %v5312_v32  ;;  %v4574_v54 = vpack.c.bf16 %v3826_v58, %v3822_v53  ;;  %v4576_v15 = vpack.c.bf16 %v3825_v26, %v3821_v48  ;;  %v3849_v52 = vld [vmem:[#allocation3 + $0xe0] sm:$0xff]  ;;  %v3862_v58 = vld [vmem:[#allocation3 + $0x148] sm:$0xff] }
 0x14c   :  { %v3572_v17 = vrot.slane %v3315_v59, %v5999_v27  ;;  %v2988_v49 = vrot.slane %v2974_v38, %v5312_v32  ;;  %v6031_v33 = vsub.s32 %v3474_v6, %v5289_v10  ;;  %v4578_v39 = vpack.c.bf16 %v3834_v4, %v3830_v28  ;;  %v3853_v53 = vld [vmem:[#allocation3 + $0x100] sm:$0xff]  ;;  %v3866_v48 = vld [vmem:[#allocation3 + $0x168] sm:$0xff] }
 0x14d   :  { %v2445_v57 = vcombine.low %v2437_v0, %v2444_v34  ;;  %4575 = vmatprep.subr.bf16.mxu1 %v4574_v54  ;;  %v4580_v22 = vpack.c.bf16 %v3833_v41, %v3829_v8  ;;  %v4582_v43 = vpack.c.bf16 %v3842_v16, %v3838_v11  ;;  %v3481_v7 = vadd.s32 4294967264, %v5718_v40  ;;  %v3874_v8 = vld [vmem:[#allocation3 + $0x1a8] sm:$0xff]  ;;  %v3869_v11 = vld [vmem:[#allocation3 + $0x180] sm:$0xff] }
 0x14e   :  { %v3573_v19 = vsel %vm3465_vm1, %v3572_v17, %v3568_v62  ;;  %3305 = vperm.xlu1 %4881, %v2428_v29   ;;  %4577 = vmatpush1.bf16.msra.mxu1 %v4576_v15  ;;  %v2989_v23 = vcombine.low %v2981_v30, %v2988_v49  ;;  %v4584_v46 = vpack.c.bf16 %v3841_v14, %v3837_v44  ;;  %v3854_v62 = vld [vmem:[#allocation3 + $0x108] sm:$0xff]  ;;  %v3488_v28 = vadd.s32 4294967256, %v5718_v40  ;;  %v3873_v16 = vld [vmem:[#allocation3 + $0x1a0] sm:$0xff] }
 0x14f   :  { %v3360_v55 = vpop.permute.xlu1 %3359  ;;  %v3318_v47 = vpop.permute.xlu0 %3317  ;;  %4579 = vmatprep.subr.bf16.mxu1 %v4578_v39  ;;  %v4586_v12 = vpack.c.bf16 %v3850_v3, %v3846_v36  ;;  %v6043_v29 = vsub.s32 %v3481_v7, %v5289_v10  ;;  %v3858_v17 = vld [vmem:[#allocation3 + $0x128] sm:$0xff]  ;;  %v4588_v38 = vpack.c.bf16 %v3849_v52, %v3845_v37  ;;  %v4594_v49 = vpack.c.bf16 %v3866_v48, %v3862_v58  ;;  %v3877_v7 = vld [vmem:[#allocation3 + $0x1c0] sm:$0xff] }
 0x150   :  { %v3577_v21 = vrot.slane %v3318_v47, %v6018_v18  ;;  %v3647_v50 = vrot.slane %v3360_v55, %v5995_v25  ;;  %v4966_v55 = vmov 0.0   ;;  %v3870_v15 = vld [vmem:[#allocation3 + $0x188] sm:$0xff]  ;;  %v4600_v14 = vpack.c.bf16 %v3873_v16, %v3869_v11  ;;  %v3881_v36 = vld [vmem:[#allocation3 + $0x1e0] sm:$0xff] }
 0x151   :  { %59 = vst [vmem:[#allocation2] sm:$0xf] %v4966_v55 }
 0x152   :  { %v3578_v31 = vsel %vm3472_vm2, %v3577_v21, %v3573_v19  ;;  %3401 = vperm.xlu1 %4881, %v2972_v5   ;;  %4581 = vmatpush1.bf16.msra.mxu1 %v4580_v22  ;;  %v3857_v5 = vld [vmem:[#allocation3 + $0x120] sm:$0xff]  ;;  %v3878_v22 = vld [vmem:[#allocation3 + $0x1c8] sm:$0xff] }
 0x153   :  { %v3363_v63 = vpop.permute.xlu1 %3362  ;;  %v3414_v2 = vpop.permute.xlu0 %3413  ;;  %4583 = vmatprep.subr.bf16.mxu1 %v4582_v43  ;;  %v4592_v4 = vpack.c.bf16 %v3857_v5, %v3853_v53  ;;  %v3893_v53 = vld [vmem:[#allocation3 + $0x240] sm:$0xff] }
 0x154   :  { %v3651_v42 = vrot.slane %v3363_v63, %v5999_v27  ;;  %v3735_v51 = vrot.slane %v3414_v2, %v6018_v18  ;;  %v3861_v63 = vld [vmem:[#allocation3 + $0x140] sm:$0xff] }
 0x155   :  { %v3865_v2 = vld [vmem:[#allocation3 + $0x160] sm:$0xff] }
 0x156   :  { %v6034_v9 = vsel %vm3465_vm1, %v3651_v42, %v3647_v50  ;;  %3308 = vperm.xlu1 %4881, %v2445_v57   ;;  %4585 = vmatpush1.bf16.msra.mxu1 %v4584_v46  ;;  %v6058_v57 = vsub.s32 %v3488_v28, %v5289_v10  ;;  %v4598_v42 = vpack.c.bf16 %v3874_v8, %v3870_v15  ;;  %v3886_v46 = vld [vmem:[#allocation3 + $0x208] sm:$0xff]  ;;  %v3897_v5 = vld [vmem:[#allocation3 + $0x260] sm:$0xff] }
 0x157   :  { %v3408_v1 = vpop.permute.xlu1 %3407  ;;  %v3321_v24 = vpop.permute.xlu0 %3320  ;;  %4587 = vmatprep.subr.bf16.mxu1 %v4586_v12  ;;  %v4604_v12 = vpack.c.bf16 %v3881_v36, %v3877_v7  ;;  %v3901_v28 = vld [vmem:[#allocation3 + $0x280] sm:$0xff] }
 0x158   :  { %v3582_v45 = vrot.slane %v3321_v24, %v6031_v33  ;;  %v3726_v61 = vrot.slane %v3408_v1, %v5995_v25  ;;  %v3882_v1 = vld [vmem:[#allocation3 + $0x1e8] sm:$0xff] }
 0x15a   :  { %v3583_v60 = vsel %vm3479_vm3, %v3582_v45, %v3578_v31  ;;  %3404 = vperm.xlu1 %4881, %v2989_v23   ;;  %4589 = vmatpush1.bf16.msra.mxu1 %v4588_v38  ;;  %v4602_v45 = vpack.c.bf16 %v3882_v1, %v3878_v22  ;;  %v3898_v38 = vld [vmem:[#allocation3 + $0x268] sm:$0xff] }
 0x15b   :  { %v3411_v35 = vpop.permute.xlu1 %3410  ;;  %v3417_v13 = vpop.permute.xlu0 %3416 }
 0x15c   :  { %v3730_v59 = vrot.slane %v3411_v35, %v5999_v27  ;;  %v3740_v20 = vrot.slane %v3417_v13, %v6031_v33  ;;  %v4590_v27 = vpack.c.bf16 %v3858_v17, %v3854_v62 }
 0x15e   :  { %v3731_v19 = vsel %vm3465_vm1, %v3730_v59, %v3726_v61  ;;  %4591 = vmatprep.subr.bf16.mxu1 %v4590_v27  ;;  %v3885_v61 = vld [vmem:[#allocation3 + $0x200] sm:$0xff] }
 0x15f   :  { %v3736_v47 = vsel %vm3472_vm2, %v3735_v51, %v3731_v19  ;;  %v3270_v6 = vpop.permute.xlu1 %3269  ;;  %v3324_v25 = vpop.permute.xlu0 %3323  ;;  %4593 = vmatpush1.bf16.msra.mxu1 %v4592_v4  ;;  %v3890_v51 = vld [vmem:[#allocation3 + $0x228] sm:$0xff]  ;;  %v3889_v59 = vld [vmem:[#allocation3 + $0x220] sm:$0xff] }
 0x160   :  { %v3741_v0 = vsel %vm3479_vm3, %v3740_v20, %v3736_v47  ;;  %v3471_v34 = vrot.slane %v3270_v6, %v6018_v18  ;;  %v3587_v21 = vrot.slane %v3324_v25, %v6043_v29  ;;  %4595 = vmatprep.subr.bf16.mxu1 %v4594_v49  ;;  %v4606_v52 = vpack.c.bf16 %v3890_v51, %v3886_v46  ;;  %v3894_v20 = vld [vmem:[#allocation3 + $0x248] sm:$0xff]  ;;  %v3905_v4 = vld [vmem:[#allocation3 + $0x2a0] sm:$0xff] }
 0x161   :  { %v4608_v47 = vpack.c.bf16 %v3889_v59, %v3885_v61  ;;  %v4610_v27 = vpack.c.bf16 %v3898_v38, %v3894_v20  ;;  %v3910_v49 = vld [vmem:[#allocation3 + $0x2c8] sm:$0xff]  ;;  %v3937_v61 = vld [vmem:[#allocation3 + $0x3a0] sm:$0xff] }
 0x162   :  { %v3473_v26 = vsel %vm3472_vm2, %v3471_v34, %v6011_v56  ;;  %v3588_v31 = vsel %vm3486_vm4, %v3587_v21, %v3583_v60  ;;  %v4596_v56 = vpack.c.bf16 %v3865_v2, %v3861_v63  ;;  %v3495_v60 = vadd.s32 4294967248, %v5718_v40  ;;  %v3902_v34 = vld [vmem:[#allocation3 + $0x288] sm:$0xff] }
 0x163   :  { %v3420_v30 = vpop.permute.xlu0 %3419  ;;  %v3366_v50 = vpop.permute.xlu1 %3365  ;;  %v3906_v21 = vld [vmem:[#allocation3 + $0x2a8] sm:$0xff] }
 0x164   :  { %v3745_v54 = vrot.slane %v3420_v30, %v6043_v29  ;;  %v3656_v39 = vrot.slane %v3366_v50, %v6018_v18  ;;  %4597 = vmatpush1.bf16.msra.mxu1 %v4596_v56  ;;  %v6074_v19 = vsub.s32 %v3495_v60, %v5289_v10  ;;  %v3914_v63 = vld [vmem:[#allocation3 + $0x2e8] sm:$0xff]  ;;  %v3913_v56 = vld [vmem:[#allocation3 + $0x2e0] sm:$0xff] }
 0x165   :  { %4599 = vmatprep.subr.bf16.mxu1 %v4598_v42  ;;  %v4618_v8 = vpack.c.bf16 %v3914_v63, %v3910_v49  ;;  %v3918_v50 = vld [vmem:[#allocation3 + $0x308] sm:$0xff]  ;;  %v3929_v60 = vld [vmem:[#allocation3 + $0x360] sm:$0xff] }
 0x166   :  { %v3746_v41 = vsel %vm3486_vm4, %v3745_v54, %v3741_v0  ;;  %v3657_v43 = vsel %vm3472_vm2, %v3656_v39, %v6034_v9  ;;  %v4616_v54 = vpack.c.bf16 %v3905_v4, %v3901_v28  ;;  %v3922_v42 = vld [vmem:[#allocation3 + $0x328] sm:$0xff] }
 0x167   :  { %v3327_v24 = vpop.permute.xlu0 %3326  ;;  %v4622_v1 = vpack.c.bf16 %v3922_v42, %v3918_v50  ;;  %v3934_v51 = vld [vmem:[#allocation3 + $0x388] sm:$0xff] }
 0x168   :  { %v3592_v44 = vrot.slane %v3327_v24, %v6058_v57  ;;  %4601 = vmatpush1.bf16.msra.mxu1 %v4600_v14  ;;  %v3917_v24 = vld [vmem:[#allocation3 + $0x300] sm:$0xff]  ;;  %v3930_v14 = vld [vmem:[#allocation3 + $0x368] sm:$0xff] }
 0x169   :  { %v3273_v23 = vpop.permute.xlu1 %3272  ;;  %4603 = vmatprep.subr.bf16.mxu1 %v4602_v45  ;;  %v3942_v20 = vld [vmem:[#allocation3 + $0x3c8] sm:$0xff] }
 0x16a   :  { %v3478_v3 = vrot.slane %v3273_v23, %v6031_v33  ;;  %v3593_v18 = vsel %vm3493_vm5, %v3592_v44, %v3588_v31  ;;  %v4614_v31 = vpack.c.bf16 %v3906_v21, %v3902_v34  ;;  %v3946_v38 = vld [vmem:[#allocation3 + $0x3e8] sm:$0xff] }
 0x16b   :  { %v3423_v35 = vpop.permute.xlu0 %3422 }
 0x16c   :  { %v3480_v9 = vsel %vm3479_vm3, %v3478_v3, %v3473_v26  ;;  %v3750_v13 = vrot.slane %v3423_v35, %v6058_v57  ;;  %4605 = vmatpush1.bf16.msra.mxu1 %v4604_v12  ;;  %v4612_v26 = vpack.c.bf16 %v3897_v5, %v3893_v53  ;;  %v3938_v35 = vld [vmem:[#allocation3 + $0x3a8] sm:$0xff]  ;;  %v3824_v53 = vld [vmem:[#allocation3 + $0x18] sm:$0xff] }
 0x16d   :  { %v3369_v37 = vpop.permute.xlu1 %3368  ;;  %4607 = vmatprep.subr.bf16.mxu1 %v4606_v52  ;;  %v3933_v52 = vld [vmem:[#allocation3 + $0x380] sm:$0xff]  ;;  %v3828_v5 = vld [vmem:[#allocation3 + $0x38] sm:$0xff] }
 0x16e   :  { %v3661_v62 = vrot.slane %v3369_v37, %v6031_v33  ;;  %v6071_v17 = vsel %vm3493_vm5, %v3750_v13, %v3746_v41  ;;  %v3909_v41 = vld [vmem:[#allocation3 + $0x2c0] sm:$0xff]  ;;  %v4630_v37 = vpack.c.bf16 %v3938_v35, %v3934_v51  ;;  %v4638_v34 = vpack.c.bf16 %v3828_v5, %v3824_v53  ;;  %v4139_v51 = vld [vmem:[#allocation6 + $0x58] sm:$0xff] }
 0x16f   :  { %v4620_v39 = vpack.c.bf16 %v3913_v56, %v3909_v41  ;;  %v3516_v35 = vadd.s32 4294967224, %v5718_v40  ;;  %v3537_v53 = vadd.s32 4294967200, %v5718_v40 }
 0x170   :  { %v3662_v55 = vsel %vm3479_vm3, %v3661_v62, %v3657_v43  ;;  %v3330_v25 = vpop.permute.xlu0 %3329  ;;  %4609 = vmatpush1.bf16.msra.mxu1 %v4608_v47  ;;  %v3921_v43 = vld [vmem:[#allocation3 + $0x320] sm:$0xff]  ;;  %v4634_v47 = vpack.c.bf16 %v3946_v38, %v3942_v20  ;;  %v3523_v38 = vadd.s32 4294967216, %v5718_v40 }
 0x171   :  { %v3276_v6 = vpop.permute.xlu1 %3275  ;;  %v3597_v0 = vrot.slane %v3330_v25, %v6074_v19  ;;  %4611 = vmatprep.subr.bf16.mxu1 %v4610_v27  ;;  %v4624_v7 = vpack.c.bf16 %v3921_v43, %v3917_v24  ;;  %v3945_v25 = vld [vmem:[#allocation3 + $0x3e0] sm:$0xff]  ;;  %v6160_v5 = vsub.s32 %v3516_v35, %v5289_v10 }
 0x172   :  { %v3485_v33 = vrot.slane %v3276_v6, %v6043_v29  ;;  %v3941_v6 = vld [vmem:[#allocation3 + $0x3c0] sm:$0xff] }
 0x173   :  { %v6081_v48 = vsel %vm3500_vm6, %v3597_v0, %v3593_v18  ;;  %v3925_v18 = vld [vmem:[#allocation3 + $0x340] sm:$0xff]  ;;  %v4636_v0 = vpack.c.bf16 %v3945_v25, %v3941_v6  ;;  %v3530_v25 = vadd.s32 4294967208, %v5718_v40 }
 0x174   :  { %v3487_v58 = vsel %vm3486_vm4, %v3485_v33, %v3480_v9  ;;  %4613 = vmatpush1.bf16.msra.mxu1 %v4612_v26  ;;  %v4628_v13 = vpack.c.bf16 %v3929_v60, %v3925_v18  ;;  %v4128_v24 = vld [vmem:[#allocation6] sm:$0xff]  ;;  %v4134_v18 = vld [vmem:[#allocation6 + $0x30] sm:$0xff]  ;;  %v4137_v60 = vld [vmem:[#allocation6 + $0x48] sm:$0xff] }
 0x175   :  { %v6083_v30 = vpop.permute.xlu0 %3425  ;;  %4615 = vmatprep.subr.bf16.mxu1 %v4614_v31 }
 0x178   :  { %v3372_v2 = vpop.permute.xlu1 %3371  ;;  %4617 = vmatpush1.bf16.msra.mxu1 %v4616_v54 }
 0x179   :  { %v3666_v15 = vrot.slane %v3372_v2, %v6043_v29  ;;  %4619 = vmatprep.subr.bf16.mxu1 %v4618_v8  ;;  %v3926_v29 = vld [vmem:[#allocation3 + $0x348] sm:$0xff] }
 0x17a   :  { %v4626_v3 = vpack.c.bf16 %v3930_v14, %v3926_v29  ;;  %v4133_v29 = vld [vmem:[#allocation6 + $0x28] sm:$0xff]  ;;  %v4135_v14 = vld [vmem:[#allocation6 + $0x38] sm:$0xff] }
 0x17b   :  { %v3667_v11 = vsel %vm3486_vm4, %v3666_v15, %v3662_v55  ;;  %v6087_v16 = vpop.permute.xlu0 %3332  ;;  %v4632_v55 = vpack.c.bf16 %v3937_v61, %v3933_v52  ;;  %v4710_v52 = vpack.c.bf16 %v4139_v51, %v4137_v60  ;;  %v4136_v61 = vld [vmem:[#allocation6 + $0x40] sm:$0xff]  ;;  %v6182_v51 = vsub.s32 %v3537_v53, %v5289_v10  ;;  %v4151_v53 = vld [vmem:[#allocation6 + $0xb8] sm:$0xff] }
 0x17c   :  { %4621 = vmatpush1.bf16.msra.mxu1 %v4620_v39 }
 0x17d   :  { %v3279_v22 = vpop.permute.xlu1 %3278  ;;  %4623 = vmatprep.subr.bf16.mxu1 %v4622_v1  ;;  %v4131_v1 = vld [vmem:[#allocation6 + $0x18] sm:$0xff] }
 0x17e   :  { %v3492_v44 = vrot.slane %v3279_v22, %v6058_v57  ;;  %v4129_v22 = vld [vmem:[#allocation6 + $0x8] sm:$0xff] }
 0x17f   :  { %v4702_v43 = vpack.c.bf16 %v4131_v1, %v4129_v22 }
 0x180   :  { %v3494_v23 = vsel %vm3493_vm5, %v3492_v44, %v3487_v58  ;;  %v6091_v45 = vpop.permute.xlu0 %3428  ;;  %4625 = vmatpush1.bf16.msra.mxu1 %v4624_v7  ;;  %v4130_v44 = vld [vmem:[#allocation6 + $0x10] sm:$0xff] }
 0x181   :  { %v3375_v36 = vpop.permute.xlu1 %3374  ;;  %4627 = vmatprep.subr.bf16.mxu1 %v4626_v3  ;;  %v4704_v7 = vpack.c.bf16 %v4130_v44, %v4128_v24  ;;  %v4132_v3 = vld [vmem:[#allocation6 + $0x20] sm:$0xff]  ;;  %4703 = vmatprep.subr.bf16.mxu0 %v4702_v43  ;;  %v3551_v24 = vadd.s32 4294967184, %v5718_v40 }
 0x182   :  { %v3671_v46 = vrot.slane %v3375_v36, %v6058_v57  ;;  %v4706_v36 = vpack.c.bf16 %v4135_v14, %v4133_v29  ;;  %v4140_v44 = vld [vmem:[#allocation6 + $0x60] sm:$0xff]  ;;  %v4142_v29 = vld [vmem:[#allocation6 + $0x70] sm:$0xff]  ;;  %v3755_v14 = vrot.slane %v6083_v30, %v6074_v19 }
 0x183   :  { %4705 = vmatpush1.bf16.msra.mxu0 %v4704_v7  ;;  %v3558_v7 = vadd.s32 4294967176, %v5718_v40 }
 0x184   :  { %v6095_v9 = vsel %vm3493_vm5, %v3671_v46, %v3667_v11  ;;  %4629 = vmatpush1.bf16.msra.mxu1 %v4628_v13  ;;  %v3509_v46 = vadd.s32 4294967232, %v5718_v40  ;;  %4707 = vmatprep.subr.bf16.mxu0 %v4706_v36  ;;  %v4145_v36 = vld [vmem:[#allocation6 + $0x88] sm:$0xff] }
 0x185   :  { %v3282_v12 = vpop.permute.xlu1 %3281  ;;  %4631 = vmatprep.subr.bf16.mxu1 %v4630_v37 }
 0x186   :  { %v3499_v59 = vrot.slane %v3282_v12, %v6074_v19  ;;  %v6098_v62 = vpop.permute.xlu0 %3335  ;;  %v4708_v12 = vpack.c.bf16 %v4134_v18, %v4132_v3  ;;  %v6155_v6 = vsub.s32 %v3509_v46, %v5289_v10  ;;  %v4147_v3 = vld [vmem:[#allocation6 + $0x98] sm:$0xff]  ;;  %v6179_v46 = vsub.s32 %v3530_v25, %v5289_v10  ;;  %v4149_v25 = vld [vmem:[#allocation6 + $0xa8] sm:$0xff] }
 0x188   :  { %v6101_v57 = vsel %vm3500_vm6, %v3499_v59, %v3494_v23  ;;  %4633 = vmatpush1.bf16.msra.mxu1 %v4632_v55  ;;  %v3502_v23 = vadd.s32 4294967240, %v5718_v40  ;;  %v4138_v59 = vld [vmem:[#allocation6 + $0x50] sm:$0xff]  ;;  %v4141_v55 = vld [vmem:[#allocation6 + $0x68] sm:$0xff]  ;;  %4709 = vmatpush1.bf16.msra.mxu0 %v4708_v12  ;;  %v3607_v30 = vrot.slane %v6098_v62, %v6155_v6  ;;  %v3756_v62 = vsel %vm3500_vm6, %v3755_v14, %v6071_v17 }
 0x189   :  { %4635 = vmatprep.subr.bf16.mxu1 %v4634_v47  ;;  %v4143_v47 = vld [vmem:[#allocation6 + $0x78] sm:$0xff]  ;;  %v4712_v22 = vpack.c.bf16 %v4138_v59, %v4136_v61  ;;  %4711 = vmatprep.subr.bf16.mxu0 %v4710_v52  ;;  %v4718_v52 = vpack.c.bf16 %v4147_v3, %v4145_v36  ;;  %v4144_v61 = vld [vmem:[#allocation6 + $0x80] sm:$0xff]  ;;  %v4146_v59 = vld [vmem:[#allocation6 + $0x90] sm:$0xff] }
 0x18a   :  { %v6103_v27 = vpop.permute.xlu1 %3377  ;;  %v6151_v20 = vsub.s32 %v3502_v23, %v5289_v10  ;;  %v4714_v43 = vpack.c.bf16 %v4143_v47, %v4141_v55  ;;  %v6171_v23 = vsub.s32 %v3523_v38, %v5289_v10  ;;  %v6205_v47 = vsub.s32 %v3558_v7, %v5289_v10  ;;  %v4148_v7 = vld [vmem:[#allocation6 + $0xa0] sm:$0xff]  ;;  %v4150_v36 = vld [vmem:[#allocation6 + $0xb0] sm:$0xff] }
 0x18b   :  { %v6105_v33 = vpop.permute.xlu0 %3431 }
 0x18c   :  { %4637 = vmatpush1.bf16.msra.mxu1 %v4636_v0  ;;  %v3544_v0 = vadd.s32 4294967192, %v5718_v40  ;;  %v3602_v18 = vrot.slane %v6087_v16, %v6151_v20  ;;  %v3760_v60 = vrot.slane %v6091_v45, %v6151_v20  ;;  %4713 = vmatpush1.bf16.msra.mxu0 %v4712_v22  ;;  %v4716_v40 = vpack.c.bf16 %v4142_v29, %v4140_v44 }
 0x18d   :  { %4639 = vmatprep.subr.bf16.mxu1 %v4638_v34  ;;  %v3765_v16 = vrot.slane %v6105_v33, %v6155_v6  ;;  %v6192_v45 = vsub.s32 %v3551_v24, %v5289_v10  ;;  %4715 = vmatprep.subr.bf16.mxu0 %v4714_v43  ;;  %v4720_v44 = vpack.c.bf16 %v4146_v59, %v4144_v61 }
 0x18e   :  { %v6187_v35 = vsub.s32 %v3544_v0, %v5289_v10  ;;  %v3603_v0 = vsel %vm3507_vm7, %v3602_v18, %v6081_v48  ;;  %v3761_v22 = vsel %vm3507_vm7, %v3760_v60, %v3756_v62  ;;  %v4724_v59 = vpack.c.bf16 %v4150_v36, %v4148_v7  ;;  %v4158_v7 = vld [vmem:[#allocation6 + $0xf0] sm:$0xff] }
 0x18f   :  { %v6107_v21 = vpop.permute.xlu1 %3284  ;;  %v6109_v58 = vpop.permute.xlu0 %3338  ;;  %v3766_v48 = vsel %vm3514_vm8, %v3765_v16, %v3761_v22 }
 0x190   :  { %v3612_v38 = vrot.slane %v6109_v58, %v6160_v5  ;;  %4717 = vmatpush1.bf16.msra.mxu0 %v4716_v40 }
 0x191   :  { %4719 = vmatprep.subr.bf16.mxu0 %v4718_v52 }
 0x193   :  { %v6111_v26 = vpop.permute.xlu1 %3380  ;;  %v6113_v31 = vpop.permute.xlu0 %3434 }
 0x194   :  { %v3770_v55 = vrot.slane %v6113_v31, %v6160_v5  ;;  %v3608_v31 = vsel %vm3514_vm8, %v3607_v30, %v3603_v0  ;;  %v4155_v30 = vld [vmem:[#allocation6 + $0xd8] sm:$0xff]  ;;  %4721 = vmatpush1.bf16.msra.mxu0 %v4720_v44 }
 0x196   :  { %v3771_v3 = vsel %vm3521_vm9, %v3770_v55, %v3766_v48 }
 0x197   :  { %v6115_v28 = vpop.permute.xlu0 %3341 }
 0x198   :  { %v6117_v4 = vpop.permute.xlu1 %3287  ;;  %v3617_v17 = vrot.slane %v6115_v28, %v6171_v23 }
 0x19c   :  { %v6119_v49 = vpop.permute.xlu0 %3437 }
 0x19d   :  { %v6121_v63 = vpop.permute.xlu1 %3383  ;;  %v3775_v58 = vrot.slane %v6119_v49, %v6171_v23  ;;  %v4722_v49 = vpack.c.bf16 %v4151_v53, %v4149_v25  ;;  %v4154_v53 = vld [vmem:[#allocation6 + $0xd0] sm:$0xff] }
 0x19f   :  { %v3776_v40 = vsel %vm3528_vm10, %v3775_v58, %v3771_v3  ;;  %4723 = vmatprep.subr.bf16.mxu0 %v4722_v49  ;;  %v4157_v58 = vld [vmem:[#allocation6 + $0xe8] sm:$0xff]  ;;  %v4156_v49 = vld [vmem:[#allocation6 + $0xe0] sm:$0xff]  ;;  %v4163_v3 = vld [vmem:[#allocation6 + $0x118] sm:$0xff] }
 0x1a0   :  { %v6123_v2 = vpop.permute.xlu0 %3344  ;;  %4725 = vmatpush1.bf16.msra.mxu0 %v4724_v59 }
 0x1a1   :  { %v6125_v54 = vpop.permute.xlu1 %3290  ;;  %v3622_v24 = vrot.slane %v6123_v2, %v6179_v46  ;;  %v3613_v2 = vsel %vm3521_vm9, %v3612_v38, %v3608_v31  ;;  %v4159_v31 = vld [vmem:[#allocation6 + $0xf8] sm:$0xff] }
 0x1a5   :  { %v6127_v15 = vpop.permute.xlu0 %3440 }
 0x1a6   :  { %v6129_v8 = vpop.permute.xlu1 %3386  ;;  %v3780_v43 = vrot.slane %v6127_v15, %v6179_v46 }
 0x1a9   :  { %v6131_v41 = vpop.permute.xlu0 %3347 }
 0x1aa   :  { %v6133_v56 = vpop.permute.xlu1 %3293  ;;  %v3627_v29 = vrot.slane %v6131_v41, %v6182_v51  ;;  %v4153_v41 = vld [vmem:[#allocation6 + $0xc8] sm:$0xff] }
 0x1ab   :  { %v4726_v25 = vpack.c.bf16 %v4155_v30, %v4153_v41  ;;  %v3681_v41 = vrot.slane %v6111_v26, %v6151_v20  ;;  %v4732_v30 = vpack.c.bf16 %v4158_v7, %v4156_v49 }
 0x1ad   :  { %4727 = vmatprep.subr.bf16.mxu0 %v4726_v25  ;;  %v4169_v25 = vld [vmem:[#allocation6 + $0x148] sm:$0xff] }
 0x1ae   :  { %v6135_v50 = vpop.permute.xlu0 %3443 }
 0x1af   :  { %v6137_v42 = vpop.permute.xlu1 %3389  ;;  %v3785_v28 = vrot.slane %v6135_v50, %v6182_v51  ;;  %v3618_v50 = vsel %vm3528_vm10, %v3617_v17, %v3613_v2  ;;  %v4161_v2 = vld [vmem:[#allocation6 + $0x108] sm:$0xff] }
 0x1b0   :  { %v3623_v61 = vsel %vm3535_vm11, %v3622_v24, %v3618_v50  ;;  %v3513_v50 = vrot.slane %v6117_v4, %v6155_v6  ;;  %v3527_v4 = vrot.slane %v6133_v56, %v6171_v23 }
 0x1b1   :  { %v3628_v62 = vsel %vm3542_vm12, %v3627_v29, %v3623_v61  ;;  %v3686_v61 = vrot.slane %v6121_v63, %v6155_v6 }
 0x1b2   :  { %v6139_v11 = vpop.permute.xlu0 %3350 }
 0x1b3   :  { %v6141_v39 = vpop.permute.xlu1 %3296  ;;  %v3632_v15 = vrot.slane %v6139_v11, %v6187_v35  ;;  %v3781_v11 = vsel %vm3535_vm11, %v3780_v43, %v3776_v40  ;;  %v4734_v40 = vpack.c.bf16 %v4163_v3, %v4161_v2 }
 0x1b4   :  { %v3786_v38 = vsel %vm3542_vm12, %v3785_v28, %v3781_v11  ;;  %v4167_v11 = vld [vmem:[#allocation6 + $0x138] sm:$0xff] }
 0x1b6   :  { %v6146_v13 = vpop.permute.xlu0 %3446 }
 0x1b7   :  { %v3790_v18 = vrot.slane %v6146_v13, %v6187_v35 }
 0x1b8   :  { %v6148_v37 = vpop.permute.xlu1 %3392 }
 0x1b9   :  { %v3791_v0 = vsel %vm3549_vm13, %v3790_v18, %v3786_v38  ;;  %v3506_v18 = vrot.slane %v6107_v21, %v6151_v20  ;;  %v4165_v21 = vld [vmem:[#allocation6 + $0x128] sm:$0xff]  ;;  %v3691_v20 = vrot.slane %v6129_v8, %v6160_v5  ;;  %v3701_v8 = vrot.slane %v6148_v37, %v6179_v46 }
 0x1ba   :  { %v4738_v56 = vpack.c.bf16 %v4167_v11, %v4165_v21  ;;  %v4178_v21 = vld [vmem:[#allocation6 + $0x190] sm:$0xff]  ;;  %v4181_v11 = vld [vmem:[#allocation6 + $0x1a8] sm:$0xff] }
 0x1bb   :  { %v6163_v34 = vpop.permute.xlu0 %3353 }
 0x1bc   :  { %v6165_v1 = vpop.permute.xlu1 %3299  ;;  %v3637_v16 = vrot.slane %v6163_v34, %v6192_v45  ;;  %v4152_v34 = vld [vmem:[#allocation6 + $0xc0] sm:$0xff] }
 0x1bd   :  { %v4728_v29 = vpack.c.bf16 %v4154_v53, %v4152_v34 }
 0x1bf   :  { %v6194_v12 = vpop.permute.xlu0 %3449  ;;  %4729 = vmatpush1.bf16.msra.mxu0 %v4728_v29 }
 0x1c0   :  { %v3795_v52 = vrot.slane %v6194_v12, %v6192_v45  ;;  %v3633_v12 = vsel %vm3549_vm13, %v3632_v15, %v3628_v62  ;;  %v3676_v15 = vrot.slane %v6103_v27, %v6074_v19  ;;  %v3520_v19 = vrot.slane %v6125_v54, %v6160_v5  ;;  %v4164_v5 = vld [vmem:[#allocation6 + $0x120] sm:$0xff]  ;;  %v4166_v62 = vld [vmem:[#allocation6 + $0x130] sm:$0xff] }
 0x1c1   :  { %v6202_v33 = vpop.permute.xlu1 %3395  ;;  %v3638_v24 = vsel %vm3556_vm14, %v3637_v16, %v3633_v12  ;;  %v4160_v16 = vld [vmem:[#allocation6 + $0x100] sm:$0xff]  ;;  %v3696_v54 = vrot.slane %v6137_v42, %v6171_v23  ;;  %v3541_v42 = vrot.slane %v6165_v1, %v6182_v51 }
 0x1c2   :  { %v3796_v43 = vsel %vm3556_vm14, %v3795_v52, %v3791_v0  ;;  %v4162_v52 = vld [vmem:[#allocation6 + $0x110] sm:$0xff]  ;;  %v3677_v26 = vsel %vm3500_vm6, %v3676_v15, %v6095_v9  ;;  %v3534_v9 = vrot.slane %v6141_v39, %v6179_v46  ;;  %v3706_v23 = vrot.slane %v6202_v33, %v6182_v51  ;;  %v4171_v39 = vld [vmem:[#allocation6 + $0x158] sm:$0xff] }
 0x1c3   :  { %v3357_v14 = vpop.permute.xlu0 %3356  ;;  %v3682_v63 = vsel %vm3507_vm7, %v3681_v41, %v3677_v26  ;;  %v4736_v6 = vpack.c.bf16 %v4162_v52, %v4160_v16  ;;  %v4740_v33 = vpack.c.bf16 %v4166_v62, %v4164_v5  ;;  %v4174_v41 = vld [vmem:[#allocation6 + $0x170] sm:$0xff]  ;;  %v124_v16 = vld [vmem:[#allocation2] sm:$0xf] }
 0x1c4   :  { %v3642_v13 = vrot.slane %v3357_v14, %v6205_v47  ;;  %v4730_v14 = vpack.c.bf16 %v4159_v31, %v4157_v58  ;;  %v4168_v31 = vld [vmem:[#allocation6 + $0x140] sm:$0xff]  ;;  %v4183_v26 = vld [vmem:[#allocation6 + $0x1b8] sm:$0xff] }
 0x1c5   :  { %v6230_v60 = vpop.permute.xlu1 %3302 }
 0x1c6   :  { %v3643_v44 = vsel %vm3563_vm15, %v3642_v13, %v3638_v24  ;;  %4731 = vmatprep.subr.bf16.mxu0 %v4730_v14  ;;  %v3508_v13 = vsel %vm3507_vm7, %v3506_v18, %v6101_v57  ;;  %v3687_v57 = vsel %vm3514_vm8, %v3686_v61, %v3682_v63  ;;  %v3548_v46 = vrot.slane %v6230_v60, %v6187_v35  ;;  %v4170_v24 = vld [vmem:[#allocation6 + $0x150] sm:$0xff]  ;;  %v4172_v18 = vld [vmem:[#allocation6 + $0x160] sm:$0xff] }
 0x1c7   :  { %v3453_v55 = vpop.permute.xlu0 %3452  ;;  %4733 = vmatpush1.bf16.msra.mxu0 %v4732_v30  ;;  %v3515_v59 = vsel %vm3514_vm8, %v3513_v50, %v3508_v13  ;;  %v3692_v34 = vsel %vm3521_vm9, %v3691_v20, %v3687_v57  ;;  %v4742_v60 = vpack.c.bf16 %v4171_v39, %v4169_v25  ;;  %v4177_v50 = vld [vmem:[#allocation6 + $0x188] sm:$0xff]  ;;  %v4748_v52 = vpack.c.bf16 %v4174_v41, %v4172_v18  ;;  %v4180_v63 = vld [vmem:[#allocation6 + $0x1a0] sm:$0xff]  ;;  %v3836_v25 = vld [vmem:[#allocation3 + $0x78] sm:$0xff] }
 0x1c8   :  { %v3800_v17 = vrot.slane %v3453_v55, %v6205_v47  ;;  %4735 = vmatprep.subr.bf16.mxu0 %v4734_v40  ;;  %v3522_v38 = vsel %vm3521_vm9, %v3520_v19, %v3515_v59  ;;  %v3697_v12 = vsel %vm3528_vm10, %v3696_v54, %v3692_v34  ;;  %v4179_v40 = vld [vmem:[#allocation6 + $0x198] sm:$0xff]  ;;  %v4754_v13 = vpack.c.bf16 %v4183_v26, %v4181_v11  ;;  %v4182_v54 = vld [vmem:[#allocation6 + $0x1b0] sm:$0xff] }
 0x1c9   :  { %v6245_v22 = vpop.permute.xlu1 %3398  ;;  %v3529_v37 = vsel %vm3528_vm10, %v3527_v4, %v3522_v38  ;;  %v4750_v19 = vpack.c.bf16 %v4179_v40, %v4177_v50  ;;  %v4756_v59 = vpack.c.bf16 %v4182_v54, %v4180_v63  ;;  %v3823_v38 = vld [vmem:[#allocation3 + $0x10] sm:$0xff]  ;;  %v3876_v18 = vld [vmem:[#allocation3 + $0x1b8] sm:$0xff] }
 0x1ca   :  { %v3801_v48 = vsel %vm3563_vm15, %v3800_v17, %v3796_v43  ;;  %v3711_v53 = vrot.slane %v6245_v22, %v6187_v35  ;;  %v3536_v0 = vsel %vm3535_vm11, %v3534_v9, %v3529_v37  ;;  %v3702_v17 = vsel %vm3535_vm11, %v3701_v8, %v3697_v12  ;;  %v4184_v8 = vld [vmem:[#allocation6 + $0x1c0] sm:$0xff]  ;;  %v3840_v12 = vld [vmem:[#allocation3 + $0x98] sm:$0xff]  ;;  %v3871_v50 = vld [vmem:[#allocation3 + $0x190] sm:$0xff] }
 0x1cb   :  { %v6253_v28 = vsel %vm3802_vm0, %v3801_v48, %v3643_v44  ;;  %4737 = vmatpush1.bf16.msra.mxu0 %v4736_v6  ;;  %v3543_v35 = vsel %vm3542_vm12, %v3541_v42, %v3536_v0  ;;  %v3707_v22 = vsel %vm3542_vm12, %v3706_v23, %v3702_v17  ;;  %v4173_v44 = vld [vmem:[#allocation6 + $0x168] sm:$0xff]  ;;  %v4175_v48 = vld [vmem:[#allocation6 + $0x178] sm:$0xff]  ;;  %v3827_v42 = vld [vmem:[#allocation3 + $0x30] sm:$0xff] }
 0x1cc   :  { %4739 = vmatprep.subr.bf16.mxu0 %v4738_v56  ;;  %v3712_v29 = vsel %vm3549_vm13, %v3711_v53, %v3707_v22  ;;  %v4746_v15 = vpack.c.bf16 %v4175_v48, %v4173_v44  ;;  %v4187_v6 = vld [vmem:[#allocation6 + $0x1d8] sm:$0xff]  ;;  %v4186_v56 = vld [vmem:[#allocation6 + $0x1d0] sm:$0xff]  ;;  %v4640_v34 = vpack.c.bf16 %v3827_v42, %v3823_v38 }
 0x1cd   :  { %v6255_v36 = vpop.permute.xlu1 %3305  ;;  %v4760_v62 = vpack.c.bf16 %v4186_v56, %v4184_v8  ;;  %v3835_v53 = vld [vmem:[#allocation3 + $0x70] sm:$0xff]  ;;  %v3848_v17 = vld [vmem:[#allocation3 + $0xd8] sm:$0xff] }
 0x1ce   :  { %v3555_v1 = vrot.slane %v6255_v36, %v6192_v45  ;;  %v4744_v36 = vpack.c.bf16 %v4170_v24, %v4168_v31  ;;  %v3843_v0 = vld [vmem:[#allocation3 + $0xb0] sm:$0xff]  ;;  %v3856_v22 = vld [vmem:[#allocation3 + $0x118] sm:$0xff] }
 0x1cf   :  { %4741 = vmatpush1.bf16.msra.mxu0 %v4740_v33  ;;  %v3839_v33 = vld [vmem:[#allocation3 + $0x90] sm:$0xff]  ;;  %v3892_v11 = vld [vmem:[#allocation3 + $0x238] sm:$0xff] }
 0x1d0   :  { %4743 = vmatprep.subr.bf16.mxu0 %v4742_v60  ;;  %v4648_v60 = vpack.c.bf16 %v3843_v0, %v3839_v33  ;;  %v3847_v24 = vld [vmem:[#allocation3 + $0xd0] sm:$0xff]  ;;  %v3896_v63 = vld [vmem:[#allocation3 + $0x258] sm:$0xff] }
 0x1d1   :  { %v3402_v27 = vpop.permute.xlu1 %3401  ;;  %v3875_v40 = vld [vmem:[#allocation3 + $0x1b0] sm:$0xff]  ;;  %v3900_v54 = vld [vmem:[#allocation3 + $0x278] sm:$0xff] }
 0x1d2   :  { %v3716_v51 = vrot.slane %v3402_v27, %v6192_v45  ;;  %v3550_v45 = vsel %vm3549_vm13, %v3548_v46, %v3543_v35  ;;  %v4176_v27 = vld [vmem:[#allocation6 + $0x180] sm:$0xff]  ;;  %v3831_v46 = vld [vmem:[#allocation3 + $0x50] sm:$0xff]  ;;  %v3904_v8 = vld [vmem:[#allocation3 + $0x298] sm:$0xff] }
 0x1d3   :  { %v3557_v49 = vsel %vm3556_vm14, %v3555_v1, %v3550_v45  ;;  %4745 = vmatpush1.bf16.msra.mxu0 %v4744_v36  ;;  %v4752_v4 = vpack.c.bf16 %v4178_v21, %v4176_v27  ;;  %v3844_v1 = vld [vmem:[#allocation3 + $0xb8] sm:$0xff]  ;;  %v3851_v35 = vld [vmem:[#allocation3 + $0xf0] sm:$0xff] }
 0x1d4   :  { %v3717_v7 = vsel %vm3556_vm14, %v3716_v51, %v3712_v29  ;;  %4747 = vmatprep.subr.bf16.mxu0 %v4746_v15  ;;  %v4644_v51 = vpack.c.bf16 %v3835_v53, %v3831_v46  ;;  %v4652_v44 = vpack.c.bf16 %v3851_v35, %v3847_v24  ;;  %v3855_v45 = vld [vmem:[#allocation3 + $0x110] sm:$0xff]  ;;  %v3872_v15 = vld [vmem:[#allocation3 + $0x198] sm:$0xff] }
 0x1d5   :  { %v3309_v55 = vpop.permute.xlu1 %3308  ;;  %v3859_v29 = vld [vmem:[#allocation3 + $0x130] sm:$0xff]  ;;  %v3888_v21 = vld [vmem:[#allocation3 + $0x218] sm:$0xff] }
 0x1d6   :  { %v3562_v58 = vrot.slane %v3309_v55, %v6205_v47  ;;  %v3832_v55 = vld [vmem:[#allocation3 + $0x58] sm:$0xff]  ;;  %v3883_v27 = vld [vmem:[#allocation3 + $0x1f0] sm:$0xff] }
 0x1d7   :  { %4749 = vmatpush1.bf16.msra.mxu0 %v4748_v52  ;;  %v4642_v37 = vpack.c.bf16 %v3836_v25, %v3832_v55  ;;  %v4664_v52 = vpack.c.bf16 %v3875_v40, %v3871_v50  ;;  %v3908_v56 = vld [vmem:[#allocation3 + $0x2b8] sm:$0xff]  ;;  %v3907_v38 = vld [vmem:[#allocation3 + $0x2b0] sm:$0xff]  ;;  %v4193_v40 = vld [vmem:[#allocation6 + $0x208] sm:$0xff] }
 0x1d8   :  { %v3564_v2 = vsel %vm3563_vm15, %v3562_v58, %v3557_v49  ;;  %4751 = vmatprep.subr.bf16.mxu0 %v4750_v19  ;;  %v3852_v58 = vld [vmem:[#allocation3 + $0xf8] sm:$0xff]  ;;  %v3879_v19 = vld [vmem:[#allocation3 + $0x1d0] sm:$0xff] }
 0x1d9   :  { %v3405_v43 = vpop.permute.xlu1 %3404  ;;  %v4650_v31 = vpack.c.bf16 %v3852_v58, %v3848_v17  ;;  %v3868_v49 = vld [vmem:[#allocation3 + $0x178] sm:$0xff]  ;;  %v4668_v26 = vpack.c.bf16 %v3883_v27, %v3879_v19  ;;  %v4413_v27 = vld [vmem:[%s6463_s5 + $0x8] sm:$0xff] }
 0x1da   :  { %v3721_v14 = vrot.slane %v3405_v43, %v6205_v47  ;;  %v3860_v43 = vld [vmem:[#allocation3 + $0x138] sm:$0xff] }
 0x1db   :  { %4753 = vmatpush1.bf16.msra.mxu0 %v4752_v4  ;;  %v4654_v48 = vpack.c.bf16 %v3860_v43, %v3856_v22  ;;  %v3887_v4 = vld [vmem:[#allocation3 + $0x210] sm:$0xff]  ;;  %v3912_v42 = vld [vmem:[#allocation3 + $0x2d8] sm:$0xff] }
 0x1dc   :  { %v3722_v3 = vsel %vm3563_vm15, %v3721_v14, %v3717_v7  ;;  %4755 = vmatprep.subr.bf16.mxu0 %v4754_v13  ;;  %v3864_v14 = vld [vmem:[#allocation3 + $0x158] sm:$0xff]  ;;  %v4656_v7 = vpack.c.bf16 %v3859_v29, %v3855_v45  ;;  %v3891_v13 = vld [vmem:[#allocation3 + $0x230] sm:$0xff] }
 0x1dd   :  { %v3803_v30 = vsel %vm3802_vm0, %v3722_v3, %v3564_v2  ;;  %v4658_v36 = vpack.c.bf16 %v3868_v49, %v3864_v14  ;;  %v3863_v2 = vld [vmem:[#allocation3 + $0x150] sm:$0xff]  ;;  %v3916_v55 = vld [vmem:[#allocation3 + $0x2f8] sm:$0xff] }
 0x1de   :  { %v3805_v47 = vcombine.low %v3803_v30, %v6253_v28  ;;  %v4185_v28 = vld [vmem:[#allocation6 + $0x1c8] sm:$0xff]  ;;  %v3867_v3 = vld [vmem:[#allocation3 + $0x170] sm:$0xff]  ;;  %v4662_v30 = vpack.c.bf16 %v3876_v18, %v3872_v15  ;;  %v3920_v46 = vld [vmem:[#allocation3 + $0x318] sm:$0xff] }
 0x1df   :  { %v4758_v9 = vpack.c.bf16 %v4187_v6, %v4185_v28  ;;  %4757 = vmatpush1.bf16.msra.mxu0 %v4756_v59  ;;  %v4660_v41 = vpack.c.bf16 %v3867_v3, %v3863_v2  ;;  %v4672_v28 = vpack.c.bf16 %v3891_v13, %v3887_v4  ;;  %v4674_v6 = vpack.c.bf16 %v3900_v54, %v3896_v63  ;;  %v3895_v59 = vld [vmem:[#allocation3 + $0x250] sm:$0xff]  ;;  %v3924_v53 = vld [vmem:[#allocation3 + $0x338] sm:$0xff]  ;;  %v4189_v3 = vld [vmem:[#allocation6 + $0x1e8] sm:$0xff] }
 0x1e0   :  { %v3812_v61 = vrot.slane %v3805_v47, %v5312_v32  ;;  %v3880_v47 = vld [vmem:[#allocation3 + $0x1d8] sm:$0xff]  ;;  %v4414_v4 = vld [vmem:[%s6463_s5 + $0x10] sm:$0xff]  ;;  %v4433_v54 = vld [vmem:[%s6463_s5 + $0xa8] sm:$0xff] }
 0x1e1   :  { %4759 = vmatprep.subr.bf16.mxu0 %v4758_v9  ;;  %v3899_v9 = vld [vmem:[#allocation3 + $0x270] sm:$0xff]  ;;  %v3928_v33 = vld [vmem:[#allocation3 + $0x358] sm:$0xff] }
 0x1e2   :  { %v3814_v20 = vadd.f32 %v3812_v61, %v124_v16  ;;  %v3884_v16 = vld [vmem:[#allocation3 + $0x1f8] sm:$0xff] }
 0x1e3   :  { %4761 = vmatpush1.bf16.msra.mxu0 %v4760_v62  ;;  %v4666_v61 = vpack.c.bf16 %v3884_v16, %v3880_v47  ;;  %v4678_v62 = vpack.c.bf16 %v3908_v56, %v3904_v8  ;;  %v3932_v0 = vld [vmem:[#allocation3 + $0x378] sm:$0xff]  ;;  %v4434_v8 = vld [vmem:[%s6463_s5 + $0xb0] sm:$0xff] }
 0x1e4   :  { %3815 = vst [vmem:[#allocation2] sm:$0xf] %v3814_v20  ;;  %v4670_v20 = vpack.c.bf16 %v3892_v11, %v3888_v21  ;;  %v4690_v58 = vpack.c.bf16 %v3932_v0, %v3928_v33  ;;  %v3936_v24 = vld [vmem:[#allocation3 + $0x398] sm:$0xff]  ;;  %v4430_v21 = vld [vmem:[%s6463_s5 + $0x90] sm:$0xff]  ;;  %v4441_v0 = vld [vmem:[%s6463_s5 + $0xe8] sm:$0xff] }
 0x1e5   :  { %v3940_v35 = vld [vmem:[#allocation3 + $0x3b8] sm:$0xff] }
 0x1e6   :  { %v4694_v43 = vpack.c.bf16 %v3940_v35, %v3936_v24  ;;  %v3944_v45 = vld [vmem:[#allocation3 + $0x3d8] sm:$0xff]  ;;  %v3957_v24 = vsub.s32 1, %v5289_v10 }
 0x1e7   :  { %v3948_v29 = vld [vmem:[#allocation3 + $0x3f8] sm:$0xff] }
 0x1e8   :  { %v4698_v49 = vpack.c.bf16 %v3948_v29, %v3944_v45  ;;  %v4191_v15 = vld [vmem:[#allocation6 + $0x1f8] sm:$0xff]  ;;  %v4192_v45 = vld [vmem:[#allocation6 + $0x200] sm:$0xff]  ;;  %v4194_v29 = vld [vmem:[#allocation6 + $0x210] sm:$0xff] }
 0x1e9   :  { %v4762_v18 = vpack.c.bf16 %v4191_v15, %v4189_v3  ;;  %v4195_v47 = vld [vmem:[#allocation6 + $0x218] sm:$0xff] }
 0x1ea   :  { %v4766_v16 = vpack.c.bf16 %v4195_v47, %v4193_v40  ;;  %v4431_v11 = vld [vmem:[%s6463_s5 + $0x98] sm:$0xff]  ;;  %v4432_v63 = vld [vmem:[%s6463_s5 + $0xa0] sm:$0xff] }
 0x1eb   :  { %v3819_v5 = vld [vmem:[#allocation2] sm:$0xf]  ;;  %4763 = vmatprep.subr.bf16.mxu0 %v4762_v18  ;;  %v4415_v13 = vld [vmem:[%s6463_s5 + $0x18] sm:$0xff]  ;;  %v4196_v18 = vld [vmem:[#allocation6 + $0x220] sm:$0xff] }
 0x1ec   :  { %v3820_v57 = vmul.f32 0.015625, %v3819_v5  ;;  %v4676_v5 = vpack.c.bf16 %v3899_v9, %v3895_v59  ;;  %v4416_v59 = vld [vmem:[%s6463_s5 + $0x20] sm:$0xff]  ;;  %v4417_v9 = vld [vmem:[%s6463_s5 + $0x28] sm:$0xff]  ;;  %v4435_v56 = vld [vmem:[%s6463_s5 + $0xb8] sm:$0xff] }
 0x1ed   :  { %v4440_v33 = vld [vmem:[%s6463_s5 + $0xe0] sm:$0xff] }
 0x1ee   :  { %v6317_v23 = vrot.slane %v3820_v57, %v5312_v32  ;;  %v4646_v32 = vpack.c.bf16 %v3844_v1, %v3840_v12  ;;  %v3903_v57 = vld [vmem:[#allocation3 + $0x290] sm:$0xff]  ;;  %v4686_v1 = vpack.c.bf16 %v3924_v53, %v3920_v46 }
 0x1ef   :  { %v4680_v25 = vpack.c.bf16 %v3907_v38, %v3903_v57  ;;  %v4418_v57 = vld [vmem:[%s6463_s5 + $0x30] sm:$0xff]  ;;  %v4419_v38 = vld [vmem:[%s6463_s5 + $0x38] sm:$0xff] }
 0x1f0   :  { %v3979_v39 = vcombine.high %v6317_v23, %v6317_v23  ;;  %v4438_v46 = vld [vmem:[%s6463_s5 + $0xd0] sm:$0xff]  ;;  %v4439_v53 = vld [vmem:[%s6463_s5 + $0xd8] sm:$0xff] }
 0x1f2   :  { %4046 = vmatprep.mubr.f32.mxu1 %v3979_v39 }
 0x1f3   :  { %4047 = vmatmul.mubr.f32.vlgmr.msra.gmra.mrb[0].mxu1 %v6317_v23 }
 0x1f4   :  { %4641 = vmatpush1.bf16.msra.mxu1 %v4640_v34  ;;  %4117 = vmatprep.mubr.f32.mxu1 %v3979_v39  ;;  %v4682_v39 = vpack.c.bf16 %v3916_v55, %v3912_v42  ;;  %v3911_v34 = vld [vmem:[#allocation3 + $0x2d0] sm:$0xff]  ;;  %v4436_v42 = vld [vmem:[%s6463_s5 + $0xc0] sm:$0xff]  ;;  %v4437_v55 = vld [vmem:[%s6463_s5 + $0xc8] sm:$0xff] }
 0x1f5   :  { %4643 = vmatprep.subr.bf16.mxu1 %v4642_v37  ;;  %v3915_v37 = vld [vmem:[#allocation3 + $0x2f0] sm:$0xff] }
 0x1f6   :  { %v4684_v12 = vpack.c.bf16 %v3915_v37, %v3911_v34  ;;  %v4420_v34 = vld [vmem:[%s6463_s5 + $0x40] sm:$0xff]  ;;  %v4421_v37 = vld [vmem:[%s6463_s5 + $0x48] sm:$0xff] }
 0x1f8   :  { %4645 = vmatpush1.bf16.msra.mxu1 %v4644_v51  ;;  %v3919_v51 = vld [vmem:[#allocation3 + $0x310] sm:$0xff] }
 0x1f9   :  { %4647 = vmatprep.subr.bf16.mxu1 %v4646_v32  ;;  %v3923_v32 = vld [vmem:[#allocation3 + $0x330] sm:$0xff] }
 0x1fa   :  { %v4688_v17 = vpack.c.bf16 %v3923_v32, %v3919_v51  ;;  %v4422_v51 = vld [vmem:[%s6463_s5 + $0x50] sm:$0xff]  ;;  %v4423_v32 = vld [vmem:[%s6463_s5 + $0x58] sm:$0xff] }
 0x1fc   :  { %4649 = vmatpush1.bf16.msra.mxu1 %v4648_v60  ;;  %v3927_v60 = vld [vmem:[#allocation3 + $0x350] sm:$0xff] }
 0x1fd   :  { %4651 = vmatprep.subr.bf16.mxu1 %v4650_v31  ;;  %v3931_v31 = vld [vmem:[#allocation3 + $0x370] sm:$0xff] }
 0x1fe   :  { %v4692_v22 = vpack.c.bf16 %v3931_v31, %v3927_v60  ;;  %v3953_v60 = vsub.s32 0, %v5289_v10  ;;  %v6405_v31 = vld [vmem:[%s6460_s2] sm:$0xf] }
 0x200   :  { %4653 = vmatpush1.bf16.msra.mxu1 %v4652_v44  ;;  %v3935_v44 = vld [vmem:[#allocation3 + $0x390] sm:$0xff]  ;;  %v3954_v35 = vrot.slane %v6405_v31, %v3953_v60 }
 0x201   :  { %4655 = vmatprep.subr.bf16.mxu1 %v4654_v48  ;;  %v3939_v48 = vld [vmem:[#allocation3 + $0x3b0] sm:$0xff] }
 0x202   :  { %v4696_v14 = vpack.c.bf16 %v3939_v48, %v3935_v44 }
 0x204   :  { %4657 = vmatpush1.bf16.msra.mxu1 %v4656_v7  ;;  %v3943_v7 = vld [vmem:[#allocation3 + $0x3d0] sm:$0xff] }
 0x205   :  { %4659 = vmatprep.subr.bf16.mxu1 %v4658_v36  ;;  %v3947_v36 = vld [vmem:[#allocation3 + $0x3f0] sm:$0xff] }
 0x206   :  { %v4700_v2 = vpack.c.bf16 %v3947_v36, %v3943_v7  ;;  %v4199_v7 = vld [vmem:[#allocation6 + $0x238] sm:$0xff] }
 0x208   :  { %4661 = vmatpush1.bf16.msra.mxu1 %v4660_v41  ;;  %v4188_v41 = vld [vmem:[#allocation6 + $0x1e0] sm:$0xff] }
 0x209   :  { %4663 = vmatprep.subr.bf16.mxu1 %v4662_v30  ;;  %v4190_v30 = vld [vmem:[#allocation6 + $0x1f0] sm:$0xff] }
 0x20a   :  { %v4764_v50 = vpack.c.bf16 %v4190_v30, %v4188_v41  ;;  %v4198_v41 = vld [vmem:[#allocation6 + $0x230] sm:$0xff]  ;;  %v4201_v30 = vld [vmem:[#allocation6 + $0x248] sm:$0xff] }
 0x20b   :  { %v4772_v40 = vpack.c.bf16 %v4198_v41, %v4196_v18  ;;  %v4236_v18 = vld [vmem:[#allocation6 + $0x360] sm:$0xff]  ;;  %v4238_v41 = vld [vmem:[#allocation6 + $0x370] sm:$0xff] }
 0x20c   :  { %4665 = vmatpush1.bf16.msra.mxu1 %v4664_v52  ;;  %4765 = vmatpush1.bf16.msra.mxu0 %v4764_v50  ;;  %v4428_v52 = vld [vmem:[%s6463_s5 + $0x80] sm:$0xff] }
 0x20d   :  { %4667 = vmatprep.subr.bf16.mxu1 %v4666_v61  ;;  %4767 = vmatprep.subr.bf16.mxu0 %v4766_v16  ;;  %v4412_v61 = vld [vmem:[%s6463_s5] sm:$0xff] }
 0x20e   :  { %v4203_v50 = vld [vmem:[#allocation6 + $0x258] sm:$0xff]  ;;  %v4200_v16 = vld [vmem:[#allocation6 + $0x240] sm:$0xff] }
 0x20f   :  { %v4774_v47 = vpack.c.bf16 %v4203_v50, %v4201_v30  ;;  %v4241_v30 = vld [vmem:[#allocation6 + $0x388] sm:$0xff]  ;;  %v4243_v50 = vld [vmem:[#allocation6 + $0x398] sm:$0xff] }
 0x210   :  { %4669 = vmatpush1.bf16.msra.mxu1 %v4668_v26  ;;  %v4832_v26 = vpack.c.bf16 %v4413_v27, %v4412_v61  ;;  %v4207_v61 = vld [vmem:[#allocation6 + $0x278] sm:$0xff] }
 0x211   :  { %4671 = vmatprep.subr.bf16.mxu1 %v4670_v20  ;;  %v4834_v20 = vpack.c.bf16 %v4431_v11, %v4430_v21  ;;  %v4204_v21 = vld [vmem:[#allocation6 + $0x260] sm:$0xff]  ;;  %v4206_v11 = vld [vmem:[#allocation6 + $0x270] sm:$0xff] }
 0x214   :  { %4673 = vmatpush1.bf16.msra.mxu1 %v4672_v28  ;;  %v4836_v28 = vpack.c.bf16 %v4415_v13, %v4414_v4  ;;  %v4780_v4 = vpack.c.bf16 %v4206_v11, %v4204_v21  ;;  %v4244_v21 = vld [vmem:[#allocation6 + $0x3a0] sm:$0xff]  ;;  %v4246_v11 = vld [vmem:[#allocation6 + $0x3b0] sm:$0xff] }
 0x215   :  { %4675 = vmatprep.subr.bf16.mxu1 %v4674_v6  ;;  %v4838_v6 = vpack.c.bf16 %v4433_v54, %v4432_v63  ;;  %v4208_v63 = vld [vmem:[#allocation6 + $0x280] sm:$0xff]  ;;  %v4210_v54 = vld [vmem:[#allocation6 + $0x290] sm:$0xff] }
 0x218   :  { %4677 = vmatpush1.bf16.msra.mxu1 %v4676_v5  ;;  %v4840_v5 = vpack.c.bf16 %v4417_v9, %v4416_v59  ;;  %v4784_v59 = vpack.c.bf16 %v4210_v54, %v4208_v63  ;;  %v3961_v63 = vsub.s32 2, %v5289_v10  ;;  %v4248_v54 = vld [vmem:[#allocation6 + $0x3c0] sm:$0xff] }
 0x219   :  { %4679 = vmatprep.subr.bf16.mxu1 %v4678_v62  ;;  %v4842_v62 = vpack.c.bf16 %v4435_v56, %v4434_v8  ;;  %v4212_v8 = vld [vmem:[#allocation6 + $0x2a0] sm:$0xff]  ;;  %v4214_v56 = vld [vmem:[#allocation6 + $0x2b0] sm:$0xff] }
 0x21c   :  { %4681 = vmatpush1.bf16.msra.mxu1 %v4680_v25  ;;  %v4844_v25 = vpack.c.bf16 %v4419_v38, %v4418_v57  ;;  %v4788_v57 = vpack.c.bf16 %v4214_v56, %v4212_v8  ;;  %v3962_v56 = vrot.slane %v6405_v31, %v3961_v63 }
 0x21d   :  { %4683 = vmatprep.subr.bf16.mxu1 %v4682_v39  ;;  %v4846_v39 = vpack.c.bf16 %v4437_v55, %v4436_v42  ;;  %v4216_v42 = vld [vmem:[#allocation6 + $0x2c0] sm:$0xff]  ;;  %v4218_v55 = vld [vmem:[#allocation6 + $0x2d0] sm:$0xff] }
 0x220   :  { %4685 = vmatpush1.bf16.msra.mxu1 %v4684_v12  ;;  %v4848_v12 = vpack.c.bf16 %v4421_v37, %v4420_v34  ;;  %v4792_v34 = vpack.c.bf16 %v4218_v55, %v4216_v42 }
 0x221   :  { %4687 = vmatprep.subr.bf16.mxu1 %v4686_v1  ;;  %v4850_v1 = vpack.c.bf16 %v4439_v53, %v4438_v46  ;;  %v4220_v46 = vld [vmem:[#allocation6 + $0x2e0] sm:$0xff]  ;;  %v4222_v53 = vld [vmem:[#allocation6 + $0x2f0] sm:$0xff] }
 0x224   :  { %4689 = vmatpush1.bf16.msra.mxu1 %v4688_v17  ;;  %v4852_v17 = vpack.c.bf16 %v4423_v32, %v4422_v51  ;;  %v4796_v51 = vpack.c.bf16 %v4222_v53, %v4220_v46  ;;  %v4424_v53 = vld [vmem:[%s6463_s5 + $0x60] sm:$0xff] }
 0x225   :  { %4691 = vmatprep.subr.bf16.mxu1 %v4690_v58  ;;  %v4854_v58 = vpack.c.bf16 %v4441_v0, %v4440_v33  ;;  %v4224_v33 = vld [vmem:[#allocation6 + $0x300] sm:$0xff]  ;;  %v4226_v0 = vld [vmem:[#allocation6 + $0x310] sm:$0xff] }
 0x228   :  { %4693 = vmatpush1.bf16.msra.mxu1 %v4692_v22  ;;  %v3958_v22 = vrot.slane %v6405_v31, %v3957_v24 }
 0x229   :  { %4695 = vmatprep.subr.bf16.mxu1 %v4694_v43 }
 0x22c   :  { %4697 = vmatpush1.bf16.msra.mxu1 %v4696_v14 }
 0x22d   :  { %4699 = vmatprep.subr.bf16.mxu1 %v4698_v49  ;;  %v4197_v49 = vld [vmem:[#allocation6 + $0x228] sm:$0xff] }
 0x22e   :  { %v4770_v15 = vpack.c.bf16 %v4199_v7, %v4197_v49  ;;  %v4232_v49 = vld [vmem:[#allocation6 + $0x340] sm:$0xff]  ;;  %v4234_v7 = vld [vmem:[#allocation6 + $0x350] sm:$0xff] }
 0x230   :  { %4701 = vmatpush1.bf16.msra.mxu1 %v4700_v2  ;;  %v4768_v2 = vpack.c.bf16 %v4194_v29, %v4192_v45  ;;  %v4235_v45 = vld [vmem:[#allocation6 + $0x358] sm:$0xff] }
 0x233   :  { %4118 = vmatmul.mubr.f32.vlgmr.msra.gmra.mrb[2].mxu1 %v6317_v23  ;;  %v4429_v23 = vld [vmem:[%s6463_s5 + $0x88] sm:$0xff] }
 0x234   :  { %v4830_v19 = vpack.c.bf16 %v4429_v23, %v4428_v52  ;;  %v4202_v52 = vld [vmem:[#allocation6 + $0x250] sm:$0xff]  ;;  %v4205_v23 = vld [vmem:[#allocation6 + $0x268] sm:$0xff] }
 0x235   :  { %v4778_v27 = vpack.c.bf16 %v4207_v61, %v4205_v23  ;;  %v4245_v23 = vld [vmem:[#allocation6 + $0x3a8] sm:$0xff]  ;;  %v4247_v61 = vld [vmem:[#allocation6 + $0x3b8] sm:$0xff] }
 0x236   :  { %4831 = vmatprep.subr.bf16.mxu1 %v4830_v19  ;;  %v4776_v19 = vpack.c.bf16 %v4202_v52, %v4200_v16  ;;  %v4240_v16 = vld [vmem:[#allocation6 + $0x380] sm:$0xff]  ;;  %v4242_v52 = vld [vmem:[#allocation6 + $0x390] sm:$0xff] }
 0x237   :  { %4833 = vmatpush3.bf16.msra.mxu1 %v4832_v26  ;;  %v4209_v26 = vld [vmem:[#allocation6 + $0x288] sm:$0xff] }
 0x238   :  { %4835 = vmatprep.subr.bf16.mxu1 %v4834_v20  ;;  %v4211_v20 = vld [vmem:[#allocation6 + $0x298] sm:$0xff] }
 0x239   :  { %v4782_v13 = vpack.c.bf16 %v4211_v20, %v4209_v26  ;;  %v4249_v26 = vld [vmem:[#allocation6 + $0x3c8] sm:$0xff]  ;;  %v4251_v20 = vld [vmem:[#allocation6 + $0x3d8] sm:$0xff] }
 0x23b   :  { %4837 = vmatpush3.bf16.msra.mxu1 %v4836_v28  ;;  %v4213_v28 = vld [vmem:[#allocation6 + $0x2a8] sm:$0xff] }
 0x23c   :  { %4839 = vmatprep.subr.bf16.mxu1 %v4838_v6  ;;  %v4215_v6 = vld [vmem:[#allocation6 + $0x2b8] sm:$0xff] }
 0x23d   :  { %v4786_v9 = vpack.c.bf16 %v4215_v6, %v4213_v28  ;;  %v4250_v28 = vld [vmem:[#allocation6 + $0x3d0] sm:$0xff]  ;;  %v3965_v6 = vsub.s32 3, %v5289_v10 }
 0x23e   :  { %v4824_v8 = vpack.c.bf16 %v4250_v28, %v4248_v54 }
 0x23f   :  { %4841 = vmatpush3.bf16.msra.mxu1 %v4840_v5  ;;  %v4217_v5 = vld [vmem:[#allocation6 + $0x2c8] sm:$0xff] }
 0x240   :  { %4843 = vmatprep.subr.bf16.mxu1 %v4842_v62  ;;  %v4219_v62 = vld [vmem:[#allocation6 + $0x2d8] sm:$0xff] }
 0x241   :  { %v4790_v38 = vpack.c.bf16 %v4219_v62, %v4217_v5  ;;  %v4252_v62 = vld [vmem:[#allocation6 + $0x3e0] sm:$0xff] }
 0x243   :  { %4845 = vmatpush3.bf16.msra.mxu1 %v4844_v25  ;;  %v4221_v25 = vld [vmem:[#allocation6 + $0x2e8] sm:$0xff] }
 0x244   :  { %4847 = vmatprep.subr.bf16.mxu1 %v4846_v39  ;;  %v4223_v39 = vld [vmem:[#allocation6 + $0x2f8] sm:$0xff] }
 0x245   :  { %v4794_v37 = vpack.c.bf16 %v4223_v39, %v4221_v25 }
 0x247   :  { %4849 = vmatpush3.bf16.msra.mxu1 %v4848_v12  ;;  %v4225_v12 = vld [vmem:[#allocation6 + $0x308] sm:$0xff] }
 0x248   :  { %4851 = vmatprep.subr.bf16.mxu1 %v4850_v1  ;;  %v4227_v1 = vld [vmem:[#allocation6 + $0x318] sm:$0xff] }
 0x249   :  { %v4798_v32 = vpack.c.bf16 %v4227_v1, %v4225_v12  ;;  %v4442_v1 = vld [vmem:[%s6463_s5 + $0xf0] sm:$0xff] }
 0x24b   :  { %4853 = vmatpush3.bf16.msra.mxu1 %v4852_v17  ;;  %v4229_v17 = vld [vmem:[#allocation6 + $0x328] sm:$0xff] }
 0x24c   :  { %4855 = vmatprep.subr.bf16.mxu1 %v4854_v58  ;;  %v4231_v58 = vld [vmem:[#allocation6 + $0x338] sm:$0xff] }
 0x2c6   :  { %v4048_v43 = vpop.f32.mrb[0].mxu1 }
 0x2c7   :  { %v4049_v44 = vadd.f32 %v4048_v43, %v3954_v35  ;;  %v4050_v48 = vpop.f32.mrb[1].mxu1  ;;  %v4800_v35 = vpack.c.bf16 %v4226_v0, %v4224_v33  ;;  %v4228_v43 = vld [vmem:[#allocation6 + $0x320] sm:$0xff]  ;;  %v4426_v33 = vld [vmem:[%s6463_s5 + $0x70] sm:$0xff]  ;;  %v4427_v0 = vld [vmem:[%s6463_s5 + $0x78] sm:$0xff] }
 0x2c8   :  { %v4051_v14 = vadd.f32 %v4050_v48, %v3958_v22  ;;  %v4802_v22 = vpack.c.bf16 %v4231_v58, %v4229_v17  ;;  %v4233_v48 = vld [vmem:[#allocation6 + $0x348] sm:$0xff]  ;;  %v4860_v17 = vpack.c.bf16 %v4427_v0, %v4426_v33  ;;  %v4256_v58 = vld [vmem:[%s6462_s4] sm:$0x3]  ;;  %s4967_s4 = smov [#allocation8]  }
 0x2c9   :  { %v4124_v3 = vmax.f32 %v4049_v44, 0.0  ;;  %v4230_v44 = vld [vmem:[#allocation6 + $0x330] sm:$0xff]  ;;  %s4528_s22 = sshll.u32 %s4967_s4, 4  ;;  %s4529_s22 = int_to_ptr.vmem [resolvable:$true] %s4528_s22 }
 0x2ca   :  { %v4125_v36 = vmax.f32 %v4051_v14, 0.0  ;;  %v4804_v29 = vpack.c.bf16 %v4230_v44, %v4228_v43  ;;  %v4806_v14 = vpack.c.bf16 %v4235_v45, %v4233_v48  ;;  %s4926_s23 = scalar_lea.vmem %s4529_s22, 32  ;;  %p4931_p3 = scmp.lt.s32.totalorder %s4529_s22, %s4529_s22 }
 0x2cb   :  { %p4927_p2 = scmp.ne.s32.totalorder %s4529_s22, %s4926_s23  ;;  %p4932_p4 = scmp.lt.s32.totalorder %s4926_s23, %s4926_s23 }
 0x2cc   :  { %4332 = vmatprep.mubr.f32.mxu0 %v4125_v36  ;;  %v4237_v36 = vld [vmem:[#allocation6 + $0x368] sm:$0xff] }
 0x2cd   :  { %4333 = vmatmul.mubr.f32.vlgmr.msra.gmra.mrb[0].mxu0 %v4124_v3  ;;  %v4808_v3 = vpack.c.bf16 %v4234_v7, %v4232_v49  ;;  %v4538_v7 = vld [vmem:[%s6464_s6] ss:$0 sm:$0xff]  ;;  %p4933_p5 = por %p4932_p4, %p4931_p3 }
 0x2ce   :  { %4769 = vmatpush1.bf16.msra.mxu0 %v4768_v2  ;;  %v4239_v2 = vld [vmem:[#allocation6 + $0x378] sm:$0xff] }
 0x2cf   :  { %4771 = vmatprep.subr.bf16.mxu0 %v4770_v15  ;;  %v4810_v15 = vpack.c.bf16 %v4239_v2, %v4237_v36  ;;  %p4934_p6 = pnand %p4933_p5, %p4927_p2 }
 0x2d2   :  { %4773 = vmatpush1.bf16.msra.mxu0 %v4772_v40  ;;  %v4812_v40 = vpack.c.bf16 %v4238_v41, %v4236_v18 }
 0x2d3   :  { %4775 = vmatprep.subr.bf16.mxu0 %v4774_v47  ;;  %v4814_v47 = vpack.c.bf16 %v4243_v50, %v4241_v30 }
 0x2d6   :  { %4777 = vmatpush1.bf16.msra.mxu0 %v4776_v19  ;;  %v4816_v19 = vpack.c.bf16 %v4242_v52, %v4240_v16 }
 0x2d7   :  { %4779 = vmatprep.subr.bf16.mxu0 %v4778_v27  ;;  %v4818_v27 = vpack.c.bf16 %v4247_v61, %v4245_v23 }
 0x2da   :  { %4781 = vmatpush1.bf16.msra.mxu0 %v4780_v4  ;;  %v4820_v4 = vpack.c.bf16 %v4246_v11, %v4244_v21 }
 0x2db   :  { %4783 = vmatprep.subr.bf16.mxu0 %v4782_v13  ;;  %v4822_v13 = vpack.c.bf16 %v4251_v20, %v4249_v26 }
 0x2de   :  { %4785 = vmatpush1.bf16.msra.mxu0 %v4784_v59  ;;  %v4253_v59 = vld [vmem:[#allocation6 + $0x3e8] sm:$0xff] }
 0x2df   :  { %4787 = vmatprep.subr.bf16.mxu0 %v4786_v9  ;;  %v4255_v9 = vld [vmem:[#allocation6 + $0x3f8] sm:$0xff] }
 0x2e0   :  { %v4826_v5 = vpack.c.bf16 %v4255_v9, %v4253_v59 }
 0x2e2   :  { %4789 = vmatpush1.bf16.msra.mxu0 %v4788_v57  ;;  %v4254_v57 = vld [vmem:[#allocation6 + $0x3f0] sm:$0xff] }
 0x2e3   :  { %4791 = vmatprep.subr.bf16.mxu0 %v4790_v38  ;;  %v3966_v38 = vrot.slane %v6405_v31, %v3965_v6  ;;  %v4828_v55 = vpack.c.bf16 %v4254_v57, %v4252_v62  ;;  %v4425_v31 = vld [vmem:[%s6463_s5 + $0x68] sm:$0xff] }
 0x2e4   :  { %v4856_v12 = vpack.c.bf16 %v4425_v31, %v4424_v53 }
 0x2e6   :  { %4793 = vmatpush1.bf16.msra.mxu0 %v4792_v34  ;;  %4857 = vmatpush3.bf16.msra.mxu1 %v4856_v12 }
 0x2e7   :  { %4795 = vmatprep.subr.bf16.mxu0 %v4794_v37 }
 0x2ea   :  { %4797 = vmatpush1.bf16.msra.mxu0 %v4796_v51  ;;  %v4443_v51 = vld [vmem:[%s6463_s5 + $0xf8] sm:$0xff] }
 0x2eb   :  { %4799 = vmatprep.subr.bf16.mxu0 %v4798_v32  ;;  %v4858_v32 = vpack.c.bf16 %v4443_v51, %v4442_v1 }
 0x2ed   :  { %4859 = vmatprep.subr.bf16.mxu1 %v4858_v32 }
 0x2ee   :  { %4801 = vmatpush1.bf16.msra.mxu0 %v4800_v35  ;;  %4861 = vmatpush3.bf16.msra.mxu1 %v4860_v17  ;;  %v4261_v35 = vrot.slane %v4256_v58, %v3953_v60 }
 0x2ef   :  { %4803 = vmatprep.subr.bf16.mxu0 %v4802_v22  ;;  %v4265_v22 = vrot.slane %v4256_v58, %v3957_v24 }
 0x2f2   :  { %4805 = vmatpush1.bf16.msra.mxu0 %v4804_v29 }
 0x2f3   :  { %4807 = vmatprep.subr.bf16.mxu0 %v4806_v14 }
 0x2f6   :  { %4809 = vmatpush1.bf16.msra.mxu0 %v4808_v3 }
 0x2f7   :  { %4811 = vmatprep.subr.bf16.mxu0 %v4810_v15 }
 0x2fa   :  { %4813 = vmatpush1.bf16.msra.mxu0 %v4812_v40 }
 0x2fb   :  { %4815 = vmatprep.subr.bf16.mxu0 %v4814_v47 }
 0x2fe   :  { %4817 = vmatpush1.bf16.msra.mxu0 %v4816_v19 }
 0x2ff   :  { %4819 = vmatprep.subr.bf16.mxu0 %v4818_v27 }
 0x302   :  { %4821 = vmatpush1.bf16.msra.mxu0 %v4820_v4 }
 0x303   :  { %4823 = vmatprep.subr.bf16.mxu0 %v4822_v13 }
 0x306   :  { %v4119_v42 = vpop.f32.mrb[2].mxu1  ;;  %4825 = vmatpush1.bf16.msra.mxu0 %v4824_v8 }
 0x307   :  { %v4120_v25 = vadd.f32 %v4119_v42, %v3962_v56  ;;  %v4121_v39 = vpop.f32.mrb[3].mxu1  ;;  %4827 = vmatprep.subr.bf16.mxu0 %v4826_v5 }
 0x308   :  { %v4122_v34 = vadd.f32 %v4121_v39, %v3966_v38 }
 0x309   :  { %v4126_v46 = vmax.f32 %v4120_v25, 0.0 }
 0x30a   :  { %v4127_v37 = vmax.f32 %v4122_v34, 0.0  ;;  %4829 = vmatpush1.bf16.msra.mxu0 %v4828_v55 }
 0x30c   :  { %4403 = vmatprep.mubr.f32.mxu0 %v4127_v37 }
 0x30d   :  { %4404 = vmatmul.mubr.f32.vlgmr.msra.gmra.mrb[0].mxu0 %v4126_v46 }
 0x3e0   :  { %v4405_v43 = vpop.f32.mrb[0].mxu0 }
 0x3e1   :  { %v4862_v44 = vadd.f32 %v4405_v43, %v4261_v35  ;;  %v4407_v48 = vpop.f32.mrb[1].mxu0 }
 0x3e2   :  { %v4863_v45 = vadd.f32 %v4407_v48, %v4265_v22 }
 0x3e3   :  { %v4410_v14 = vmax.f32 %v4862_v44, 0.0 }
 0x3e4   :  { %v4411_v29 = vmax.f32 %v4863_v45, 0.0 }
 0x3e6   :  { %4515 = vmatprep.mubr.f32.mxu1 %v4411_v29 }
 0x3e7   :  { %4516 = vmatmul.mubr.f32.vlgmr.msra.gmra.mrb[4].mxu1 %v4410_v14 }
 0x4ba   :  { %v4571_v49 = vpop.f32.mrb[4].mxu1 }
 0x4bb   :  { %v4572_v36 = vpop.f32.mrb[5].mxu1 }
 0x4bc   :  { %v4573_v60 = vadd.f32 %v4572_v36, %v4571_v49 }
 0x4be   :  { %v4518_v2 = vadd.f32 %v4573_v60, %v4538_v7 }
 0x4c0   :  { %4521 = vst [vmem:[#allocation8] sm:$0x3] %v4518_v2 }
 0x4c1   :  { %4937 = shalt.err (!%p4934_p6)
}
 0x4c2   :  { %s4938_s25 = scalar_lea.hbm %s6465_s7, 32 }
 0x4c3   :  { %p4939_p7 = scmp.ne.s32.totalorder %s6465_s7, %s4938_s25  ;;  %p4942_p8 = scmp.lt.u32.totalorder %s4938_s25, %s6465_s7 }
 0x4c5   :  { %p4944_p9 = pnand %p4942_p8, %p4939_p7 }
 0x4c7   :  { %4947 = shalt.err (!%p4944_p9)
}
 0x4c8   :  { %4531 = dma.vmem_to_hbm [thread:$0]  %s4529_s22, 32, %s6465_s7, [#allocation5]  }
 0x4c9   :  { %4952 = dma.done.wait [#allocation5], 32  }
 0x4ca   :  { %4953 = vsyncadd [#allocation5], 4294967264 }
 0x4cb   :  { %4535 = vsyncpa [#allocation4], 1 }
 0x4cc   :  { %4536 = vsyncpa [#allocation7], 1 }
 0x4cd   :  { %4537 = vsyncpa [#allocation5], 1 }

</bundles_post_ra>
